<compile_context>
chip_gen: v5e
topology: v5e:2x2
jax: 0.10.0
libtpu: 0.0.40
codegen_flags: <defaults>
</compile_context>

<pallas_src>
import jax
import jax.numpy as jnp
from jax import lax
from jax.experimental import pallas as pl
from jax.experimental.pallas import tpu as pltpu


def _round_up(x, m):
    return ((x + m - 1) // m) * m


def _make_kernel(H, W, W8, R, T, KH, KW, Cp_in, Cp_out, HO, WO, neg_slope):
    inv_count = 1.0 / float(HO * WO)

    def kernel(x_ref, w_ref, b_ref, o_ref, cbuf_ref):
        # x_ref:    (Hp, Wp, Cp_in)        bf16 zero-padded input (halo + pad)
        # w_ref:    (KH*KW, Cp_in, Cp_out) bf16 tap-major (unflipped) weights
        # b_ref:    (1, Cp_out)            f32
        # o_ref:    (1, 1, Cp_out)         f32 running sum, scaled on last strip
        # cbuf_ref: (3, R+2, W8, Cp_in)    bf16 scratch: column-shifted strip
        t = pl.program_id(1)

        @pl.when(t == 0)
        def _init():
            o_ref[...] = jnp.zeros_like(o_ref)

        a0 = pl.multiple_of(t * R, R)     # first phase-row of strip (R % 8 == 0)

        # Hoisted column shifts: 3 relayout copies per strip instead of 25
        # per-tap misaligned slices.  Each tap below is a free leading-axis
        # view + tile-aligned reshape of one of these buffers.
        for c in range(3):
            cbuf_ref[c] = x_ref[pl.ds(a0, R + 2), pl.ds(c, W8), :]

        bias_row = b_ref[...]             # (1, Cp_out)

        strip_sum = None

        # Phase (r_h, r_w): output pixels (oh, ow) = (2a + r_h, 2b + r_w).
        # Only taps with kh ≡ r_h, kw ≡ r_w (mod 2) contribute; tap (kh, kw)
        # reads x[a + (r_h+2-kh)//2, b + (r_w+2-kw)//2] (zero-padded), i.e. a
        # static row/column shift of the strip.
        for r_h in (0, 1):
            H_r = H - r_h                 # valid phase rows
            for r_w in (0, 1):
                W_r = W - r_w             # valid phase cols
                acc = None
                for kh in range(r_h, KH, 2):
                    row0 = (r_h + 2 - kh) // 2 + 1        # {0, 1, 2}
                    for kw in range(r_w, KW, 2):
                        col0 = (r_w + 2 - kw) // 2 + 1    # {0, 1, 2}
                        patch = cbuf_ref[col0, row0:row0 + R].reshape(
                            R * W8, Cp_in)                # free reshape
                        d = jnp.dot(patch, w_ref[kh * KW + kw],
                                    preferred_element_type=jnp.float32)
                        acc = d if acc is None else acc + d
                y = acc + bias_row
                y = jnp.where(y > 0, y, y * neg_slope)    # fused activation

                y3 = y.reshape(R, W8, Cp_out)             # free reshape
                if T == 1:
                    # Whole image in one strip: row validity is a free static
                    # leading-axis slice (no mask multiply at all).
                    col_sums = jnp.sum(y3[:H_r], axis=0)            # (W8, Cout)
                else:
                    # Multi-strip fallback: mask rows >= H_r (only the last
                    # strip actually has invalid rows).
                    row_ids = a0 + lax.broadcasted_iota(jnp.int32, (R, W8), 0)
                    rmask = (row_ids < H_r).astype(jnp.float32).reshape(
                        R * W8, 1)
                    col_sums = jnp.sum((y * rmask).reshape(R, W8, Cp_out),
                                       axis=0)
                # Column validity via sliced reduction (no column mask).
                phase_sum = jnp.sum(col_sums[:W_r], axis=0, keepdims=True)
                strip_sum = (phase_sum if strip_sum is None
                             else strip_sum + phase_sum)

        o_ref[0, 0, :] = o_ref[0, 0, :] + strip_sum[0]

        @pl.when(t == T - 1)
        def _finalize():
            o_ref[0, 0, :] = o_ref[0, 0, :] * inv_count

    return kernel


def prepare_params(weight, bias):
    """One-time repack of ConvTranspose2d params for the Pallas kernel.
    weight: (C_in, C_out, KH, KW) -> (KH*KW, Cp_in, Cp_out) bf16 (unflipped);
    bias: (C_out,) -> (1, Cp_out) f32.  Hoist out of the per-call path."""
    C_in, C_out, KH, KW = weight.shape
    Cp_in = _round_up(C_in, 128)
    Cp_out = _round_up(C_out, 128)
    w_t = jnp.transpose(weight.astype(jnp.float32), (2, 3, 0, 1))
    w_t = jnp.pad(w_t, ((0, 0), (0, 0), (0, Cp_in - C_in),
                        (0, Cp_out - C_out)))
    w_t = w_t.reshape(KH * KW, Cp_in, Cp_out).astype(jnp.bfloat16)
    b_p = jnp.pad(bias.astype(jnp.float32),
                  (0, Cp_out - C_out)).reshape(1, Cp_out)
    return w_t, b_p


def conv_transpose_leaky_gap(x_nchw, weight, bias, *, stride=2, padding=2,
                             block_rows=48):
    """x_nchw: (N, C_in, H, W); weight: (C_in, C_out, KH, KW); bias: (C_out,)
    Returns (N, C_out, 1, 1) float32, matching the PyTorch module."""
    N, C_in, H, W = x_nchw.shape
    wc_in, C_out, KH, KW = weight.shape
    assert wc_in == C_in
    assert stride == 2 and padding == 2 and KH == 5 and KW == 5, \
        "phase decomposition below is specialized to k=5, stride=2, padding=2"

    HO = (H - 1) * stride - 2 * padding + KH      # 2H - 1
    WO = (W - 1) * stride - 2 * padding + KW      # 2W - 1

    Cp_in = _round_up(C_in, 128)                  # lane-dense contraction dim
    Cp_out = _round_up(C_out, 128)                # lane-dense output dim

    R = min(_round_up(block_rows, 8), _round_up(H, 8))   # phase rows per strip
    T = (H + R - 1) // R                          # number of row strips
    Hp = R * T + 2                                # 1 halo row + strip padding
    W8 = _round_up(W, 8)                          # kernel working width
    Wp = W8 + 2                                   # 1 halo col + width padding

    # Glue: cast to bf16 FIRST (halves bytes moved), then NCHW->NHWC, then pad
    # halo / strip / width / channel with zeros.
    x_nhwc = jnp.transpose(x_nchw.astype(jnp.bfloat16), (0, 2, 3, 1))
    x_p = jnp.pad(x_nhwc, ((0, 0), (1, Hp - H - 1), (1, Wp - W - 1),
                           (0, Cp_in - C_in)))

    w_t, b_p = prepare_params(weight, bias)

    kernel = _make_kernel(H, W, W8, R, T, KH, KW, Cp_in, Cp_out, HO, WO,
                          -0.419)

    out = pl.pallas_call(
        kernel,
        out_shape=jax.ShapeDtypeStruct((N, 1, Cp_out), jnp.float32),
        grid_spec=pltpu.PrefetchScalarGridSpec(
            num_scalar_prefetch=0,
            grid=(N, T),
            in_specs=[
                pl.BlockSpec((None, Hp, Wp, Cp_in), lambda n, t: (n, 0, 0, 0)),
                pl.BlockSpec((KH * KW, Cp_in, Cp_out), lambda n, t: (0, 0, 0)),
                pl.BlockSpec((1, Cp_out), lambda n, t: (0, 0)),
            ],
            out_specs=pl.BlockSpec((1, 1, Cp_out), lambda n, t: (n, 0, 0)),
            scratch_shapes=[pltpu.VMEM((3, R + 2, W8, Cp_in), jnp.bfloat16)],
        ),
        compiler_params=pltpu.CompilerParams(
            dimension_semantics=("parallel", "arbitrary"),
            vmem_limit_bytes=48 * 1024 * 1024,
        ),
    )(x_p, w_t, b_p)

    # (N, 1, Cp_out) -> slice real channels -> (N, C_out, 1, 1)
    return jnp.transpose(out[:, :, :C_out], (0, 2, 1))[:, :, :, None]


def _reference(x_nchw, weight, bias, stride=2, padding=2):
    """Pure-JAX reference (conv_transpose as lhs-dilated regular conv)."""
    C_in, C_out, KH, KW = weight.shape
    pad = KH - 1 - padding
    w_oihw = jnp.flip(weight, axis=(2, 3)).transpose(1, 0, 2, 3)
    y = lax.conv_general_dilated(
        x_nchw.astype(jnp.float32), w_oihw.astype(jnp.float32),
        window_strides=(1, 1),
        padding=[(pad, pad), (pad, pad)],
        lhs_dilation=(stride, stride),
        dimension_numbers=("NCHW", "OIHW", "NCHW"))
    y = y + bias[None, :, None, None]
    y = jnp.where(y > 0, y, y * -0.419)
    return jnp.mean(y, axis=(2, 3), keepdims=True)


if __name__ == "__main__":
    conv_jit = jax.jit(conv_transpose_leaky_gap,
                       static_argnames=("stride", "padding", "block_rows"))

    def run_case(N, C_in, C_out, H, W, block_rows):
        K = 5
        key = jax.random.PRNGKey(0)
        kx, kw, kb = jax.random.split(key, 3)
        x = jax.random.normal(kx, (N, C_in, H, W), jnp.float32)
        fan_in = C_out * K * K
        bound = 1.0 / (fan_in ** 0.5)
        weight = jax.random.uniform(kw, (C_in, C_out, K, K), jnp.float32,
                                    minval=-bound, maxval=bound)
        bias = jax.random.uniform(kb, (C_out,), jnp.float32,
                                  minval=-bound, maxval=bound)

        # Pre-round operands to bf16 so the bf16-MXU kernel and the f32
        # reference see identical inputs (bf16 x bf16 products are exact in
        # f32); remaining difference is accumulation order only.
        x_q = x.astype(jnp.bfloat16).astype(jnp.float32)
        w_q = weight.astype(jnp.bfloat16).astype(jnp.float32)

        out = jax.block_until_ready(
            conv_jit(x_q, w_q, bias, block_rows=block_rows))
        ref = jax.block_until_ready(_reference(x_q, w_q, bias))
        assert out.shape == (N, C_out, 1, 1), out.shape
        assert jnp.allclose(out, ref, atol=3e-4, rtol=2e-3), \
            float(jnp.max(jnp.abs(out - ref)))

    # Small shapes consistent with the module structure
    # (original module: N=25, C_in=369, C_out=223, H=46, W=60, k=5).
    # Case 1: single-strip path (T=1), W a multiple of 8.
    run_case(N=2, C_in=8, C_out=16, H=8, W=8, block_rows=48)
    # Case 2: multi-strip resident-accumulator path — H not a multiple of
    # block_rows (T=3), W not a multiple of 8, channels not multiples of 128.
    run_case(N=1, C_in=9, C_out=7, H=20, W=12, block_rows=8)

    print("KERNEL_OK")
</pallas_src>

<mosaic_0001>
module attributes {stable_mosaic.version = 11 : i64} {
  func.func @kernel(%arg0: i32, %arg1: i32, %arg2: memref<1x10x10x128xbf16, #tpu.memory_space<vmem>>, %arg3: memref<25x128x128xbf16, #tpu.memory_space<vmem>>, %arg4: memref<1x128xf32, #tpu.memory_space<vmem>>, %arg5: memref<1x1x128xf32, #tpu.memory_space<vmem>>, %arg6: memref<3x10x8x128xbf16, #tpu.memory_space<vmem>>) attributes {dimension_semantics = [#tpu.dimension_semantics<parallel>, #tpu.dimension_semantics<arbitrary>], iteration_bounds = array<i64: 2, 1>, scalar_prefetch = 0 : i64, scratch_operands = 1 : i64, tpu.core_type = #tpu.core_type<tc>, window_params = [{transform_indices = @transform_0, window_bounds = array<i64: 1, 10, 10, 128>}, {pipeline_mode = #tpu.pipeline_mode<synchronous>, transform_indices = @transform_1, window_bounds = array<i64: 25, 128, 128>}, {pipeline_mode = #tpu.pipeline_mode<synchronous>, transform_indices = @transform_2, window_bounds = array<i64: 1, 128>}, {transform_indices = @transform_3, window_bounds = array<i64: 1, 1, 128>}]} {
    %c0_i32 = arith.constant 0 : i32
    %0 = arith.cmpi eq, %arg1, %c0_i32 : i32
    %1 = arith.extui %0 : i1 to i32
    %c0_i32_0 = arith.constant 0 : i32
    %2 = arith.cmpi ne, %1, %c0_i32_0 : i32
    scf.if %2 {
      %cst_222 = arith.constant 0.000000e+00 : f32
      %256 = vector.broadcast %cst_222 : f32 to vector<1x1x128xf32>
      %c0_223 = arith.constant 0 : index
      %c0_224 = arith.constant 0 : index
      %c0_225 = arith.constant 0 : index
      %257 = vector.load %arg5[%c0_223, %c0_224, %c0_225] : memref<1x1x128xf32, #tpu.memory_space<vmem>>, vector<1x1x128xf32>
      tpu.vector_store %arg5[%c0_223, %c0_224, %c0_225], %256 {strides = array<i32>} : memref<1x1x128xf32, #tpu.memory_space<vmem>>, vector<1x1x128xf32>,
    } else {
    }
    %c8_i32 = arith.constant 8 : i32
    %3 = arith.muli %arg1, %c8_i32 : i32
    %4 = tpu.assume_multiple %3, 8 : i32
    %c0 = arith.constant 0 : index
    %5 = arith.index_cast %4 : i32 to index
    %c0_1 = arith.constant 0 : index
    %c0_2 = arith.constant 0 : index
    %6 = vector.load %arg2[%c0, %5, %c0_1, %c0_2] : memref<1x10x10x128xbf16, #tpu.memory_space<vmem>>, vector<1x10x8x128xbf16>
    %7 = vector.shape_cast %6 : vector<1x10x8x128xbf16> to vector<10x8x128xbf16>
    %c0_3 = arith.constant 0 : index
    %c0_4 = arith.constant 0 : index
    %c0_5 = arith.constant 0 : index
    %c0_6 = arith.constant 0 : index
    %8 = vector.load %arg6[%c0_3, %c0_4, %c0_5, %c0_6] : memref<3x10x8x128xbf16, #tpu.memory_space<vmem>>, vector<1x10x8x128xbf16>
    %9 = vector.shape_cast %8 : vector<1x10x8x128xbf16> to vector<10x8x128xbf16>
    %10 = vector.shape_cast %7 : vector<10x8x128xbf16> to vector<1x10x8x128xbf16>
    tpu.vector_store %arg6[%c0_3, %c0_4, %c0_5, %c0_6], %10 {strides = array<i32>} : memref<3x10x8x128xbf16, #tpu.memory_space<vmem>>, vector<1x10x8x128xbf16>,
    %c0_7 = arith.constant 0 : index
    %11 = arith.index_cast %4 : i32 to index
    %c1 = arith.constant 1 : index
    %c0_8 = arith.constant 0 : index
    %12 = vector.load %arg2[%c0_7, %11, %c1, %c0_8] : memref<1x10x10x128xbf16, #tpu.memory_space<vmem>>, vector<1x10x8x128xbf16>
    %13 = vector.shape_cast %12 : vector<1x10x8x128xbf16> to vector<10x8x128xbf16>
    %c1_9 = arith.constant 1 : index
    %c0_10 = arith.constant 0 : index
    %c0_11 = arith.constant 0 : index
    %c0_12 = arith.constant 0 : index
    %14 = vector.load %arg6[%c1_9, %c0_10, %c0_11, %c0_12] : memref<3x10x8x128xbf16, #tpu.memory_space<vmem>>, vector<1x10x8x128xbf16>
    %15 = vector.shape_cast %14 : vector<1x10x8x128xbf16> to vector<10x8x128xbf16>
    %16 = vector.shape_cast %13 : vector<10x8x128xbf16> to vector<1x10x8x128xbf16>
    tpu.vector_store %arg6[%c1_9, %c0_10, %c0_11, %c0_12], %16 {strides = array<i32>} : memref<3x10x8x128xbf16, #tpu.memory_space<vmem>>, vector<1x10x8x128xbf16>,
    %c0_13 = arith.constant 0 : index
    %17 = arith.index_cast %4 : i32 to index
    %c2 = arith.constant 2 : index
    %c0_14 = arith.constant 0 : index
    %18 = vector.load %arg2[%c0_13, %17, %c2, %c0_14] : memref<1x10x10x128xbf16, #tpu.memory_space<vmem>>, vector<1x10x8x128xbf16>
    %19 = vector.shape_cast %18 : vector<1x10x8x128xbf16> to vector<10x8x128xbf16>
    %c2_15 = arith.constant 2 : index
    %c0_16 = arith.constant 0 : index
    %c0_17 = arith.constant 0 : index
    %c0_18 = arith.constant 0 : index
    %20 = vector.load %arg6[%c2_15, %c0_16, %c0_17, %c0_18] : memref<3x10x8x128xbf16, #tpu.memory_space<vmem>>, vector<1x10x8x128xbf16>
    %21 = vector.shape_cast %20 : vector<1x10x8x128xbf16> to vector<10x8x128xbf16>
    %22 = vector.shape_cast %19 : vector<10x8x128xbf16> to vector<1x10x8x128xbf16>
    tpu.vector_store %arg6[%c2_15, %c0_16, %c0_17, %c0_18], %22 {strides = array<i32>} : memref<3x10x8x128xbf16, #tpu.memory_space<vmem>>, vector<1x10x8x128xbf16>,
    %c0_19 = arith.constant 0 : index
    %c0_20 = arith.constant 0 : index
    %23 = vector.load %arg4[%c0_19, %c0_20] : memref<1x128xf32, #tpu.memory_space<vmem>>, vector<1x128xf32>
    %c2_21 = arith.constant 2 : index
    %c2_22 = arith.constant 2 : index
    %c0_23 = arith.constant 0 : index
    %c0_24 = arith.constant 0 : index
    %24 = vector.load %arg6[%c2_21, %c2_22, %c0_23, %c0_24] : memref<3x10x8x128xbf16, #tpu.memory_space<vmem>>, vector<1x8x8x128xbf16>
    %25 = vector.shape_cast %24 : vector<1x8x8x128xbf16> to vector<8x8x128xbf16>
    %26 = vector.shape_cast %25 : vector<8x8x128xbf16> to vector<64x128xbf16>
    %c0_25 = arith.constant 0 : index
    %c0_26 = arith.constant 0 : index
    %c0_27 = arith.constant 0 : index
    %27 = vector.load %arg3[%c0_25, %c0_26, %c0_27] : memref<25x128x128xbf16, #tpu.memory_space<vmem>>, vector<1x128x128xbf16>
    %28 = vector.shape_cast %27 : vector<1x128x128xbf16> to vector<128x128xbf16>
    %cst = arith.constant dense<0.000000e+00> : vector<64x128xf32>
    %29 = tpu.matmul %26, %28, %cst {dimension_numbers = #tpu.dot_dimension_numbers<[1], [0], [0], [1], [0, 0, 1, 1], [], []>} : vector<64x128xbf16>, vector<128x128xbf16>, vector<64x128xf32> -> vector<64x128xf32>
    %c1_28 = arith.constant 1 : index
    %c2_29 = arith.constant 2 : index
    %c0_30 = arith.constant 0 : index
    %c0_31 = arith.constant 0 : index
    %30 = vector.load %arg6[%c1_28, %c2_29, %c0_30, %c0_31] : memref<3x10x8x128xbf16, #tpu.memory_space<vmem>>, vector<1x8x8x128xbf16>
    %31 = vector.shape_cast %30 : vector<1x8x8x128xbf16> to vector<8x8x128xbf16>
    %32 = vector.shape_cast %31 : vector<8x8x128xbf16> to vector<64x128xbf16>
    %c2_32 = arith.constant 2 : index
    %c0_33 = arith.constant 0 : index
    %c0_34 = arith.constant 0 : index
    %33 = vector.load %arg3[%c2_32, %c0_33, %c0_34] : memref<25x128x128xbf16, #tpu.memory_space<vmem>>, vector<1x128x128xbf16>
    %34 = vector.shape_cast %33 : vector<1x128x128xbf16> to vector<128x128xbf16>
    %cst_35 = arith.constant dense<0.000000e+00> : vector<64x128xf32>
    %35 = tpu.matmul %32, %34, %cst_35 {dimension_numbers = #tpu.dot_dimension_numbers<[1], [0], [0], [1], [0, 0, 1, 1], [], []>} : vector<64x128xbf16>, vector<128x128xbf16>, vector<64x128xf32> -> vector<64x128xf32>
    %36 = arith.addf %29, %35 : vector<64x128xf32>
    %c0_36 = arith.constant 0 : index
    %c2_37 = arith.constant 2 : index
    %c0_38 = arith.constant 0 : index
    %c0_39 = arith.constant 0 : index
    %37 = vector.load %arg6[%c0_36, %c2_37, %c0_38, %c0_39] : memref<3x10x8x128xbf16, #tpu.memory_space<vmem>>, vector<1x8x8x128xbf16>
    %38 = vector.shape_cast %37 : vector<1x8x8x128xbf16> to vector<8x8x128xbf16>
    %39 = vector.shape_cast %38 : vector<8x8x128xbf16> to vector<64x128xbf16>
    %c4 = arith.constant 4 : index
    %c0_40 = arith.constant 0 : index
    %c0_41 = arith.constant 0 : index
    %40 = vector.load %arg3[%c4, %c0_40, %c0_41] : memref<25x128x128xbf16, #tpu.memory_space<vmem>>, vector<1x128x128xbf16>
    %41 = vector.shape_cast %40 : vector<1x128x128xbf16> to vector<128x128xbf16>
    %cst_42 = arith.constant dense<0.000000e+00> : vector<64x128xf32>
    %42 = tpu.matmul %39, %41, %cst_42 {dimension_numbers = #tpu.dot_dimension_numbers<[1], [0], [0], [1], [0, 0, 1, 1], [], []>} : vector<64x128xbf16>, vector<128x128xbf16>, vector<64x128xf32> -> vector<64x128xf32>
    %43 = arith.addf %36, %42 : vector<64x128xf32>
    %c2_43 = arith.constant 2 : index
    %c1_44 = arith.constant 1 : index
    %c0_45 = arith.constant 0 : index
    %c0_46 = arith.constant 0 : index
    %44 = vector.load %arg6[%c2_43, %c1_44, %c0_45, %c0_46] : memref<3x10x8x128xbf16, #tpu.memory_space<vmem>>, vector<1x8x8x128xbf16>
    %45 = vector.shape_cast %44 : vector<1x8x8x128xbf16> to vector<8x8x128xbf16>
    %46 = vector.shape_cast %45 : vector<8x8x128xbf16> to vector<64x128xbf16>
    %c10 = arith.constant 10 : index
    %c0_47 = arith.constant 0 : index
    %c0_48 = arith.constant 0 : index
    %47 = vector.load %arg3[%c10, %c0_47, %c0_48] : memref<25x128x128xbf16, #tpu.memory_space<vmem>>, vector<1x128x128xbf16>
    %48 = vector.shape_cast %47 : vector<1x128x128xbf16> to vector<128x128xbf16>
    %cst_49 = arith.constant dense<0.000000e+00> : vector<64x128xf32>
    %49 = tpu.matmul %46, %48, %cst_49 {dimension_numbers = #tpu.dot_dimension_numbers<[1], [0], [0], [1], [0, 0, 1, 1], [], []>} : vector<64x128xbf16>, vector<128x128xbf16>, vector<64x128xf32> -> vector<64x128xf32>
    %50 = arith.addf %43, %49 : vector<64x128xf32>
    %c1_50 = arith.constant 1 : index
    %c1_51 = arith.constant 1 : index
    %c0_52 = arith.constant 0 : index
    %c0_53 = arith.constant 0 : index
    %51 = vector.load %arg6[%c1_50, %c1_51, %c0_52, %c0_53] : memref<3x10x8x128xbf16, #tpu.memory_space<vmem>>, vector<1x8x8x128xbf16>
    %52 = vector.shape_cast %51 : vector<1x8x8x128xbf16> to vector<8x8x128xbf16>
    %53 = vector.shape_cast %52 : vector<8x8x128xbf16> to vector<64x128xbf16>
    %c12 = arith.constant 12 : index
    %c0_54 = arith.constant 0 : index
    %c0_55 = arith.constant 0 : index
    %54 = vector.load %arg3[%c12, %c0_54, %c0_55] : memref<25x128x128xbf16, #tpu.memory_space<vmem>>, vector<1x128x128xbf16>
    %55 = vector.shape_cast %54 : vector<1x128x128xbf16> to vector<128x128xbf16>
    %cst_56 = arith.constant dense<0.000000e+00> : vector<64x128xf32>
    %56 = tpu.matmul %53, %55, %cst_56 {dimension_numbers = #tpu.dot_dimension_numbers<[1], [0], [0], [1], [0, 0, 1, 1], [], []>} : vector<64x128xbf16>, vector<128x128xbf16>, vector<64x128xf32> -> vector<64x128xf32>
    %57 = arith.addf %50, %56 : vector<64x128xf32>
    %c0_57 = arith.constant 0 : index
    %c1_58 = arith.constant 1 : index
    %c0_59 = arith.constant 0 : index
    %c0_60 = arith.constant 0 : index
    %58 = vector.load %arg6[%c0_57, %c1_58, %c0_59, %c0_60] : memref<3x10x8x128xbf16, #tpu.memory_space<vmem>>, vector<1x8x8x128xbf16>
    %59 = vector.shape_cast %58 : vector<1x8x8x128xbf16> to vector<8x8x128xbf16>
    %60 = vector.shape_cast %59 : vector<8x8x128xbf16> to vector<64x128xbf16>
    %c14 = arith.constant 14 : index
    %c0_61 = arith.constant 0 : index
    %c0_62 = arith.constant 0 : index
    %61 = vector.load %arg3[%c14, %c0_61, %c0_62] : memref<25x128x128xbf16, #tpu.memory_space<vmem>>, vector<1x128x128xbf16>
    %62 = vector.shape_cast %61 : vector<1x128x128xbf16> to vector<128x128xbf16>
    %cst_63 = arith.constant dense<0.000000e+00> : vector<64x128xf32>
    %63 = tpu.matmul %60, %62, %cst_63 {dimension_numbers = #tpu.dot_dimension_numbers<[1], [0], [0], [1], [0, 0, 1, 1], [], []>} : vector<64x128xbf16>, vector<128x128xbf16>, vector<64x128xf32> -> vector<64x128xf32>
    %64 = arith.addf %57, %63 : vector<64x128xf32>
    %c2_64 = arith.constant 2 : index
    %c0_65 = arith.constant 0 : index
    %c0_66 = arith.constant 0 : index
    %c0_67 = arith.constant 0 : index
    %65 = vector.load %arg6[%c2_64, %c0_65, %c0_66, %c0_67] : memref<3x10x8x128xbf16, #tpu.memory_space<vmem>>, vector<1x8x8x128xbf16>
    %66 = vector.shape_cast %65 : vector<1x8x8x128xbf16> to vector<8x8x128xbf16>
    %67 = vector.shape_cast %66 : vector<8x8x128xbf16> to vector<64x128xbf16>
    %c20 = arith.constant 20 : index
    %c0_68 = arith.constant 0 : index
    %c0_69 = arith.constant 0 : index
    %68 = vector.load %arg3[%c20, %c0_68, %c0_69] : memref<25x128x128xbf16, #tpu.memory_space<vmem>>, vector<1x128x128xbf16>
    %69 = vector.shape_cast %68 : vector<1x128x128xbf16> to vector<128x128xbf16>
    %cst_70 = arith.constant dense<0.000000e+00> : vector<64x128xf32>
    %70 = tpu.matmul %67, %69, %cst_70 {dimension_numbers = #tpu.dot_dimension_numbers<[1], [0], [0], [1], [0, 0, 1, 1], [], []>} : vector<64x128xbf16>, vector<128x128xbf16>, vector<64x128xf32> -> vector<64x128xf32>
    %71 = arith.addf %64, %70 : vector<64x128xf32>
    %c1_71 = arith.constant 1 : index
    %c0_72 = arith.constant 0 : index
    %c0_73 = arith.constant 0 : index
    %c0_74 = arith.constant 0 : index
    %72 = vector.load %arg6[%c1_71, %c0_72, %c0_73, %c0_74] : memref<3x10x8x128xbf16, #tpu.memory_space<vmem>>, vector<1x8x8x128xbf16>
    %73 = vector.shape_cast %72 : vector<1x8x8x128xbf16> to vector<8x8x128xbf16>
    %74 = vector.shape_cast %73 : vector<8x8x128xbf16> to vector<64x128xbf16>
    %c22 = arith.constant 22 : index
    %c0_75 = arith.constant 0 : index
    %c0_76 = arith.constant 0 : index
    %75 = vector.load %arg3[%c22, %c0_75, %c0_76] : memref<25x128x128xbf16, #tpu.memory_space<vmem>>, vector<1x128x128xbf16>
    %76 = vector.shape_cast %75 : vector<1x128x128xbf16> to vector<128x128xbf16>
    %cst_77 = arith.constant dense<0.000000e+00> : vector<64x128xf32>
    %77 = tpu.matmul %74, %76, %cst_77 {dimension_numbers = #tpu.dot_dimension_numbers<[1], [0], [0], [1], [0, 0, 1, 1], [], []>} : vector<64x128xbf16>, vector<128x128xbf16>, vector<64x128xf32> -> vector<64x128xf32>
    %78 = arith.addf %71, %77 : vector<64x128xf32>
    %c0_78 = arith.constant 0 : index
    %c0_79 = arith.constant 0 : index
    %c0_80 = arith.constant 0 : index
    %c0_81 = arith.constant 0 : index
    %79 = vector.load %arg6[%c0_78, %c0_79, %c0_80, %c0_81] : memref<3x10x8x128xbf16, #tpu.memory_space<vmem>>, vector<1x8x8x128xbf16>
    %80 = vector.shape_cast %79 : vector<1x8x8x128xbf16> to vector<8x8x128xbf16>
    %81 = vector.shape_cast %80 : vector<8x8x128xbf16> to vector<64x128xbf16>
    %c24 = arith.constant 24 : index
    %c0_82 = arith.constant 0 : index
    %c0_83 = arith.constant 0 : index
    %82 = vector.load %arg3[%c24, %c0_82, %c0_83] : memref<25x128x128xbf16, #tpu.memory_space<vmem>>, vector<1x128x128xbf16>
    %83 = vector.shape_cast %82 : vector<1x128x128xbf16> to vector<128x128xbf16>
    %cst_84 = arith.constant dense<0.000000e+00> : vector<64x128xf32>
    %84 = tpu.matmul %81, %83, %cst_84 {dimension_numbers = #tpu.dot_dimension_numbers<[1], [0], [0], [1], [0, 0, 1, 1], [], []>} : vector<64x128xbf16>, vector<128x128xbf16>, vector<64x128xf32> -> vector<64x128xf32>
    %85 = arith.addf %78, %84 : vector<64x128xf32>
    %86 = vector.broadcast %23 : vector<1x128xf32> to vector<64x128xf32>
    %87 = arith.addf %85, %86 : vector<64x128xf32>
    %cst_85 = arith.constant 0.000000e+00 : f32
    %88 = vector.broadcast %cst_85 : f32 to vector<64x128xf32>
    %89 = arith.cmpf ogt, %87, %88 : vector<64x128xf32>
    %cst_86 = arith.constant -4.190000e-01 : f32
    %90 = vector.broadcast %cst_86 : f32 to vector<64x128xf32>
    %91 = arith.mulf %87, %90 : vector<64x128xf32>
    %92 = arith.select %89, %87, %91 : vector<64x128xi1>, vector<64x128xf32>
    %93 = vector.shape_cast %92 : vector<64x128xf32> to vector<8x8x128xf32>
    %cst_87 = arith.constant dense<0.000000e+00> : vector<8x128xf32>
    %94 = vector.multi_reduction <add>, %93, %cst_87 [0] : vector<8x8x128xf32> to vector<8x128xf32>
    %cst_88 = arith.constant dense<0.000000e+00> : vector<128xf32>
    %95 = vector.multi_reduction <add>, %94, %cst_88 [0] : vector<8x128xf32> to vector<128xf32>
    %96 = vector.shape_cast %95 : vector<128xf32> to vector<1x128xf32>
    %c2_89 = arith.constant 2 : index
    %c2_90 = arith.constant 2 : index
    %c0_91 = arith.constant 0 : index
    %c0_92 = arith.constant 0 : index
    %97 = vector.load %arg6[%c2_89, %c2_90, %c0_91, %c0_92] : memref<3x10x8x128xbf16, #tpu.memory_space<vmem>>, vector<1x8x8x128xbf16>
    %98 = vector.shape_cast %97 : vector<1x8x8x128xbf16> to vector<8x8x128xbf16>
    %99 = vector.shape_cast %98 : vector<8x8x128xbf16> to vector<64x128xbf16>
    %c1_93 = arith.constant 1 : index
    %c0_94 = arith.constant 0 : index
    %c0_95 = arith.constant 0 : index
    %100 = vector.load %arg3[%c1_93, %c0_94, %c0_95] : memref<25x128x128xbf16, #tpu.memory_space<vmem>>, vector<1x128x128xbf16>
    %101 = vector.shape_cast %100 : vector<1x128x128xbf16> to vector<128x128xbf16>
    %cst_96 = arith.constant dense<0.000000e+00> : vector<64x128xf32>
    %102 = tpu.matmul %99, %101, %cst_96 {dimension_numbers = #tpu.dot_dimension_numbers<[1], [0], [0], [1], [0, 0, 1, 1], [], []>} : vector<64x128xbf16>, vector<128x128xbf16>, vector<64x128xf32> -> vector<64x128xf32>
    %c1_97 = arith.constant 1 : index
    %c2_98 = arith.constant 2 : index
    %c0_99 = arith.constant 0 : index
    %c0_100 = arith.constant 0 : index
    %103 = vector.load %arg6[%c1_97, %c2_98, %c0_99, %c0_100] : memref<3x10x8x128xbf16, #tpu.memory_space<vmem>>, vector<1x8x8x128xbf16>
    %104 = vector.shape_cast %103 : vector<1x8x8x128xbf16> to vector<8x8x128xbf16>
    %105 = vector.shape_cast %104 : vector<8x8x128xbf16> to vector<64x128xbf16>
    %c3 = arith.constant 3 : index
    %c0_101 = arith.constant 0 : index
    %c0_102 = arith.constant 0 : index
    %106 = vector.load %arg3[%c3, %c0_101, %c0_102] : memref<25x128x128xbf16, #tpu.memory_space<vmem>>, vector<1x128x128xbf16>
    %107 = vector.shape_cast %106 : vector<1x128x128xbf16> to vector<128x128xbf16>
    %cst_103 = arith.constant dense<0.000000e+00> : vector<64x128xf32>
    %108 = tpu.matmul %105, %107, %cst_103 {dimension_numbers = #tpu.dot_dimension_numbers<[1], [0], [0], [1], [0, 0, 1, 1], [], []>} : vector<64x128xbf16>, vector<128x128xbf16>, vector<64x128xf32> -> vector<64x128xf32>
    %109 = arith.addf %102, %108 : vector<64x128xf32>
    %c2_104 = arith.constant 2 : index
    %c1_105 = arith.constant 1 : index
    %c0_106 = arith.constant 0 : index
    %c0_107 = arith.constant 0 : index
    %110 = vector.load %arg6[%c2_104, %c1_105, %c0_106, %c0_107] : memref<3x10x8x128xbf16, #tpu.memory_space<vmem>>, vector<1x8x8x128xbf16>
    %111 = vector.shape_cast %110 : vector<1x8x8x128xbf16> to vector<8x8x128xbf16>
    %112 = vector.shape_cast %111 : vector<8x8x128xbf16> to vector<64x128xbf16>
    %c11 = arith.constant 11 : index
    %c0_108 = arith.constant 0 : index
    %c0_109 = arith.constant 0 : index
    %113 = vector.load %arg3[%c11, %c0_108, %c0_109] : memref<25x128x128xbf16, #tpu.memory_space<vmem>>, vector<1x128x128xbf16>
    %114 = vector.shape_cast %113 : vector<1x128x128xbf16> to vector<128x128xbf16>
    %cst_110 = arith.constant dense<0.000000e+00> : vector<64x128xf32>
    %115 = tpu.matmul %112, %114, %cst_110 {dimension_numbers = #tpu.dot_dimension_numbers<[1], [0], [0], [1], [0, 0, 1, 1], [], []>} : vector<64x128xbf16>, vector<128x128xbf16>, vector<64x128xf32> -> vector<64x128xf32>
    %116 = arith.addf %109, %115 : vector<64x128xf32>
    %c1_111 = arith.constant 1 : index
    %c1_112 = arith.constant 1 : index
    %c0_113 = arith.constant 0 : index
    %c0_114 = arith.constant 0 : index
    %117 = vector.load %arg6[%c1_111, %c1_112, %c0_113, %c0_114] : memref<3x10x8x128xbf16, #tpu.memory_space<vmem>>, vector<1x8x8x128xbf16>
    %118 = vector.shape_cast %117 : vector<1x8x8x128xbf16> to vector<8x8x128xbf16>
    %119 = vector.shape_cast %118 : vector<8x8x128xbf16> to vector<64x128xbf16>
    %c13 = arith.constant 13 : index
    %c0_115 = arith.constant 0 : index
    %c0_116 = arith.constant 0 : index
    %120 = vector.load %arg3[%c13, %c0_115, %c0_116] : memref<25x128x128xbf16, #tpu.memory_space<vmem>>, vector<1x128x128xbf16>
    %121 = vector.shape_cast %120 : vector<1x128x128xbf16> to vector<128x128xbf16>
    %cst_117 = arith.constant dense<0.000000e+00> : vector<64x128xf32>
    %122 = tpu.matmul %119, %121, %cst_117 {dimension_numbers = #tpu.dot_dimension_numbers<[1], [0], [0], [1], [0, 0, 1, 1], [], []>} : vector<64x128xbf16>, vector<128x128xbf16>, vector<64x128xf32> -> vector<64x128xf32>
    %123 = arith.addf %116, %122 : vector<64x128xf32>
    %c2_118 = arith.constant 2 : index
    %c0_119 = arith.constant 0 : index
    %c0_120 = arith.constant 0 : index
    %c0_121 = arith.constant 0 : index
    %124 = vector.load %arg6[%c2_118, %c0_119, %c0_120, %c0_121] : memref<3x10x8x128xbf16, #tpu.memory_space<vmem>>, vector<1x8x8x128xbf16>
    %125 = vector.shape_cast %124 : vector<1x8x8x128xbf16> to vector<8x8x128xbf16>
    %126 = vector.shape_cast %125 : vector<8x8x128xbf16> to vector<64x128xbf16>
    %c21 = arith.constant 21 : index
    %c0_122 = arith.constant 0 : index
    %c0_123 = arith.constant 0 : index
    %127 = vector.load %arg3[%c21, %c0_122, %c0_123] : memref<25x128x128xbf16, #tpu.memory_space<vmem>>, vector<1x128x128xbf16>
    %128 = vector.shape_cast %127 : vector<1x128x128xbf16> to vector<128x128xbf16>
    %cst_124 = arith.constant dense<0.000000e+00> : vector<64x128xf32>
    %129 = tpu.matmul %126, %128, %cst_124 {dimension_numbers = #tpu.dot_dimension_numbers<[1], [0], [0], [1], [0, 0, 1, 1], [], []>} : vector<64x128xbf16>, vector<128x128xbf16>, vector<64x128xf32> -> vector<64x128xf32>
    %130 = arith.addf %123, %129 : vector<64x128xf32>
    %c1_125 = arith.constant 1 : index
    %c0_126 = arith.constant 0 : index
    %c0_127 = arith.constant 0 : index
    %c0_128 = arith.constant 0 : index
    %131 = vector.load %arg6[%c1_125, %c0_126, %c0_127, %c0_128] : memref<3x10x8x128xbf16, #tpu.memory_space<vmem>>, vector<1x8x8x128xbf16>
    %132 = vector.shape_cast %131 : vector<1x8x8x128xbf16> to vector<8x8x128xbf16>
    %133 = vector.shape_cast %132 : vector<8x8x128xbf16> to vector<64x128xbf16>
    %c23 = arith.constant 23 : index
    %c0_129 = arith.constant 0 : index
    %c0_130 = arith.constant 0 : index
    %134 = vector.load %arg3[%c23, %c0_129, %c0_130] : memref<25x128x128xbf16, #tpu.memory_space<vmem>>, vector<1x128x128xbf16>
    %135 = vector.shape_cast %134 : vector<1x128x128xbf16> to vector<128x128xbf16>
    %cst_131 = arith.constant dense<0.000000e+00> : vector<64x128xf32>
    %136 = tpu.matmul %133, %135, %cst_131 {dimension_numbers = #tpu.dot_dimension_numbers<[1], [0], [0], [1], [0, 0, 1, 1], [], []>} : vector<64x128xbf16>, vector<128x128xbf16>, vector<64x128xf32> -> vector<64x128xf32>
    %137 = arith.addf %130, %136 : vector<64x128xf32>
    %138 = vector.broadcast %23 : vector<1x128xf32> to vector<64x128xf32>
    %139 = arith.addf %137, %138 : vector<64x128xf32>
    %cst_132 = arith.constant 0.000000e+00 : f32
    %140 = vector.broadcast %cst_132 : f32 to vector<64x128xf32>
    %141 = arith.cmpf ogt, %139, %140 : vector<64x128xf32>
    %cst_133 = arith.constant -4.190000e-01 : f32
    %142 = vector.broadcast %cst_133 : f32 to vector<64x128xf32>
    %143 = arith.mulf %139, %142 : vector<64x128xf32>
    %144 = arith.select %141, %139, %143 : vector<64x128xi1>, vector<64x128xf32>
    %145 = vector.shape_cast %144 : vector<64x128xf32> to vector<8x8x128xf32>
    %cst_134 = arith.constant dense<0.000000e+00> : vector<8x128xf32>
    %146 = vector.multi_reduction <add>, %145, %cst_134 [0] : vector<8x8x128xf32> to vector<8x128xf32>
    %147 = vector.extract_strided_slice %146 {offsets = [0, 0], sizes = [7, 128], strides = [1, 1]} : vector<8x128xf32> to vector<7x128xf32>
    %cst_135 = arith.constant dense<0.000000e+00> : vector<128xf32>
    %148 = vector.multi_reduction <add>, %147, %cst_135 [0] : vector<7x128xf32> to vector<128xf32>
    %149 = vector.shape_cast %148 : vector<128xf32> to vector<1x128xf32>
    %150 = arith.addf %96, %149 : vector<1x128xf32>
    %c2_136 = arith.constant 2 : index
    %c2_137 = arith.constant 2 : index
    %c0_138 = arith.constant 0 : index
    %c0_139 = arith.constant 0 : index
    %151 = vector.load %arg6[%c2_136, %c2_137, %c0_138, %c0_139] : memref<3x10x8x128xbf16, #tpu.memory_space<vmem>>, vector<1x8x8x128xbf16>
    %152 = vector.shape_cast %151 : vector<1x8x8x128xbf16> to vector<8x8x128xbf16>
    %153 = vector.shape_cast %152 : vector<8x8x128xbf16> to vector<64x128xbf16>
    %c5 = arith.constant 5 : index
    %c0_140 = arith.constant 0 : index
    %c0_141 = arith.constant 0 : index
    %154 = vector.load %arg3[%c5, %c0_140, %c0_141] : memref<25x128x128xbf16, #tpu.memory_space<vmem>>, vector<1x128x128xbf16>
    %155 = vector.shape_cast %154 : vector<1x128x128xbf16> to vector<128x128xbf16>
    %cst_142 = arith.constant dense<0.000000e+00> : vector<64x128xf32>
    %156 = tpu.matmul %153, %155, %cst_142 {dimension_numbers = #tpu.dot_dimension_numbers<[1], [0], [0], [1], [0, 0, 1, 1], [], []>} : vector<64x128xbf16>, vector<128x128xbf16>, vector<64x128xf32> -> vector<64x128xf32>
    %c1_143 = arith.constant 1 : index
    %c2_144 = arith.constant 2 : index
    %c0_145 = arith.constant 0 : index
    %c0_146 = arith.constant 0 : index
    %157 = vector.load %arg6[%c1_143, %c2_144, %c0_145, %c0_146] : memref<3x10x8x128xbf16, #tpu.memory_space<vmem>>, vector<1x8x8x128xbf16>
    %158 = vector.shape_cast %157 : vector<1x8x8x128xbf16> to vector<8x8x128xbf16>
    %159 = vector.shape_cast %158 : vector<8x8x128xbf16> to vector<64x128xbf16>
    %c7 = arith.constant 7 : index
    %c0_147 = arith.constant 0 : index
    %c0_148 = arith.constant 0 : index
    %160 = vector.load %arg3[%c7, %c0_147, %c0_148] : memref<25x128x128xbf16, #tpu.memory_space<vmem>>, vector<1x128x128xbf16>
    %161 = vector.shape_cast %160 : vector<1x128x128xbf16> to vector<128x128xbf16>
    %cst_149 = arith.constant dense<0.000000e+00> : vector<64x128xf32>
    %162 = tpu.matmul %159, %161, %cst_149 {dimension_numbers = #tpu.dot_dimension_numbers<[1], [0], [0], [1], [0, 0, 1, 1], [], []>} : vector<64x128xbf16>, vector<128x128xbf16>, vector<64x128xf32> -> vector<64x128xf32>
    %163 = arith.addf %156, %162 : vector<64x128xf32>
    %c0_150 = arith.constant 0 : index
    %c2_151 = arith.constant 2 : index
    %c0_152 = arith.constant 0 : index
    %c0_153 = arith.constant 0 : index
    %164 = vector.load %arg6[%c0_150, %c2_151, %c0_152, %c0_153] : memref<3x10x8x128xbf16, #tpu.memory_space<vmem>>, vector<1x8x8x128xbf16>
    %165 = vector.shape_cast %164 : vector<1x8x8x128xbf16> to vector<8x8x128xbf16>
    %166 = vector.shape_cast %165 : vector<8x8x128xbf16> to vector<64x128xbf16>
    %c9 = arith.constant 9 : index
    %c0_154 = arith.constant 0 : index
    %c0_155 = arith.constant 0 : index
    %167 = vector.load %arg3[%c9, %c0_154, %c0_155] : memref<25x128x128xbf16, #tpu.memory_space<vmem>>, vector<1x128x128xbf16>
    %168 = vector.shape_cast %167 : vector<1x128x128xbf16> to vector<128x128xbf16>
    %cst_156 = arith.constant dense<0.000000e+00> : vector<64x128xf32>
    %169 = tpu.matmul %166, %168, %cst_156 {dimension_numbers = #tpu.dot_dimension_numbers<[1], [0], [0], [1], [0, 0, 1, 1], [], []>} : vector<64x128xbf16>, vector<128x128xbf16>, vector<64x128xf32> -> vector<64x128xf32>
    %170 = arith.addf %163, %169 : vector<64x128xf32>
    %c2_157 = arith.constant 2 : index
    %c1_158 = arith.constant 1 : index
    %c0_159 = arith.constant 0 : index
    %c0_160 = arith.constant 0 : index
    %171 = vector.load %arg6[%c2_157, %c1_158, %c0_159, %c0_160] : memref<3x10x8x128xbf16, #tpu.memory_space<vmem>>, vector<1x8x8x128xbf16>
    %172 = vector.shape_cast %171 : vector<1x8x8x128xbf16> to vector<8x8x128xbf16>
    %173 = vector.shape_cast %172 : vector<8x8x128xbf16> to vector<64x128xbf16>
    %c15 = arith.constant 15 : index
    %c0_161 = arith.constant 0 : index
    %c0_162 = arith.constant 0 : index
    %174 = vector.load %arg3[%c15, %c0_161, %c0_162] : memref<25x128x128xbf16, #tpu.memory_space<vmem>>, vector<1x128x128xbf16>
    %175 = vector.shape_cast %174 : vector<1x128x128xbf16> to vector<128x128xbf16>
    %cst_163 = arith.constant dense<0.000000e+00> : vector<64x128xf32>
    %176 = tpu.matmul %173, %175, %cst_163 {dimension_numbers = #tpu.dot_dimension_numbers<[1], [0], [0], [1], [0, 0, 1, 1], [], []>} : vector<64x128xbf16>, vector<128x128xbf16>, vector<64x128xf32> -> vector<64x128xf32>
    %177 = arith.addf %170, %176 : vector<64x128xf32>
    %c1_164 = arith.constant 1 : index
    %c1_165 = arith.constant 1 : index
    %c0_166 = arith.constant 0 : index
    %c0_167 = arith.constant 0 : index
    %178 = vector.load %arg6[%c1_164, %c1_165, %c0_166, %c0_167] : memref<3x10x8x128xbf16, #tpu.memory_space<vmem>>, vector<1x8x8x128xbf16>
    %179 = vector.shape_cast %178 : vector<1x8x8x128xbf16> to vector<8x8x128xbf16>
    %180 = vector.shape_cast %179 : vector<8x8x128xbf16> to vector<64x128xbf16>
    %c17 = arith.constant 17 : index
    %c0_168 = arith.constant 0 : index
    %c0_169 = arith.constant 0 : index
    %181 = vector.load %arg3[%c17, %c0_168, %c0_169] : memref<25x128x128xbf16, #tpu.memory_space<vmem>>, vector<1x128x128xbf16>
    %182 = vector.shape_cast %181 : vector<1x128x128xbf16> to vector<128x128xbf16>
    %cst_170 = arith.constant dense<0.000000e+00> : vector<64x128xf32>
    %183 = tpu.matmul %180, %182, %cst_170 {dimension_numbers = #tpu.dot_dimension_numbers<[1], [0], [0], [1], [0, 0, 1, 1], [], []>} : vector<64x128xbf16>, vector<128x128xbf16>, vector<64x128xf32> -> vector<64x128xf32>
    %184 = arith.addf %177, %183 : vector<64x128xf32>
    %c0_171 = arith.constant 0 : index
    %c1_172 = arith.constant 1 : index
    %c0_173 = arith.constant 0 : index
    %c0_174 = arith.constant 0 : index
    %185 = vector.load %arg6[%c0_171, %c1_172, %c0_173, %c0_174] : memref<3x10x8x128xbf16, #tpu.memory_space<vmem>>, vector<1x8x8x128xbf16>
    %186 = vector.shape_cast %185 : vector<1x8x8x128xbf16> to vector<8x8x128xbf16>
    %187 = vector.shape_cast %186 : vector<8x8x128xbf16> to vector<64x128xbf16>
    %c19 = arith.constant 19 : index
    %c0_175 = arith.constant 0 : index
    %c0_176 = arith.constant 0 : index
    %188 = vector.load %arg3[%c19, %c0_175, %c0_176] : memref<25x128x128xbf16, #tpu.memory_space<vmem>>, vector<1x128x128xbf16>
    %189 = vector.shape_cast %188 : vector<1x128x128xbf16> to vector<128x128xbf16>
    %cst_177 = arith.constant dense<0.000000e+00> : vector<64x128xf32>
    %190 = tpu.matmul %187, %189, %cst_177 {dimension_numbers = #tpu.dot_dimension_numbers<[1], [0], [0], [1], [0, 0, 1, 1], [], []>} : vector<64x128xbf16>, vector<128x128xbf16>, vector<64x128xf32> -> vector<64x128xf32>
    %191 = arith.addf %184, %190 : vector<64x128xf32>
    %192 = vector.broadcast %23 : vector<1x128xf32> to vector<64x128xf32>
    %193 = arith.addf %191, %192 : vector<64x128xf32>
    %cst_178 = arith.constant 0.000000e+00 : f32
    %194 = vector.broadcast %cst_178 : f32 to vector<64x128xf32>
    %195 = arith.cmpf ogt, %193, %194 : vector<64x128xf32>
    %cst_179 = arith.constant -4.190000e-01 : f32
    %196 = vector.broadcast %cst_179 : f32 to vector<64x128xf32>
    %197 = arith.mulf %193, %196 : vector<64x128xf32>
    %198 = arith.select %195, %193, %197 : vector<64x128xi1>, vector<64x128xf32>
    %199 = vector.shape_cast %198 : vector<64x128xf32> to vector<8x8x128xf32>
    %200 = vector.extract_strided_slice %199 {offsets = [0, 0, 0], sizes = [7, 8, 128], strides = [1, 1, 1]} : vector<8x8x128xf32> to vector<7x8x128xf32>
    %cst_180 = arith.constant dense<0.000000e+00> : vector<8x128xf32>
    %201 = vector.multi_reduction <add>, %200, %cst_180 [0] : vector<7x8x128xf32> to vector<8x128xf32>
    %cst_181 = arith.constant dense<0.000000e+00> : vector<128xf32>
    %202 = vector.multi_reduction <add>, %201, %cst_181 [0] : vector<8x128xf32> to vector<128xf32>
    %203 = vector.shape_cast %202 : vector<128xf32> to vector<1x128xf32>
    %204 = arith.addf %150, %203 : vector<1x128xf32>
    %c2_182 = arith.constant 2 : index
    %c2_183 = arith.constant 2 : index
    %c0_184 = arith.constant 0 : index
    %c0_185 = arith.constant 0 : index
    %205 = vector.load %arg6[%c2_182, %c2_183, %c0_184, %c0_185] : memref<3x10x8x128xbf16, #tpu.memory_space<vmem>>, vector<1x8x8x128xbf16>
    %206 = vector.shape_cast %205 : vector<1x8x8x128xbf16> to vector<8x8x128xbf16>
    %207 = vector.shape_cast %206 : vector<8x8x128xbf16> to vector<64x128xbf16>
    %c6 = arith.constant 6 : index
    %c0_186 = arith.constant 0 : index
    %c0_187 = arith.constant 0 : index
    %208 = vector.load %arg3[%c6, %c0_186, %c0_187] : memref<25x128x128xbf16, #tpu.memory_space<vmem>>, vector<1x128x128xbf16>
    %209 = vector.shape_cast %208 : vector<1x128x128xbf16> to vector<128x128xbf16>
    %cst_188 = arith.constant dense<0.000000e+00> : vector<64x128xf32>
    %210 = tpu.matmul %207, %209, %cst_188 {dimension_numbers = #tpu.dot_dimension_numbers<[1], [0], [0], [1], [0, 0, 1, 1], [], []>} : vector<64x128xbf16>, vector<128x128xbf16>, vector<64x128xf32> -> vector<64x128xf32>
    %c1_189 = arith.constant 1 : index
    %c2_190 = arith.constant 2 : index
    %c0_191 = arith.constant 0 : index
    %c0_192 = arith.constant 0 : index
    %211 = vector.load %arg6[%c1_189, %c2_190, %c0_191, %c0_192] : memref<3x10x8x128xbf16, #tpu.memory_space<vmem>>, vector<1x8x8x128xbf16>
    %212 = vector.shape_cast %211 : vector<1x8x8x128xbf16> to vector<8x8x128xbf16>
    %213 = vector.shape_cast %212 : vector<8x8x128xbf16> to vector<64x128xbf16>
    %c8 = arith.constant 8 : index
    %c0_193 = arith.constant 0 : index
    %c0_194 = arith.constant 0 : index
    %214 = vector.load %arg3[%c8, %c0_193, %c0_194] : memref<25x128x128xbf16, #tpu.memory_space<vmem>>, vector<1x128x128xbf16>
    %215 = vector.shape_cast %214 : vector<1x128x128xbf16> to vector<128x128xbf16>
    %cst_195 = arith.constant dense<0.000000e+00> : vector<64x128xf32>
    %216 = tpu.matmul %213, %215, %cst_195 {dimension_numbers = #tpu.dot_dimension_numbers<[1], [0], [0], [1], [0, 0, 1, 1], [], []>} : vector<64x128xbf16>, vector<128x128xbf16>, vector<64x128xf32> -> vector<64x128xf32>
    %217 = arith.addf %210, %216 : vector<64x128xf32>
    %c2_196 = arith.constant 2 : index
    %c1_197 = arith.constant 1 : index
    %c0_198 = arith.constant 0 : index
    %c0_199 = arith.constant 0 : index
    %218 = vector.load %arg6[%c2_196, %c1_197, %c0_198, %c0_199] : memref<3x10x8x128xbf16, #tpu.memory_space<vmem>>, vector<1x8x8x128xbf16>
    %219 = vector.shape_cast %218 : vector<1x8x8x128xbf16> to vector<8x8x128xbf16>
    %220 = vector.shape_cast %219 : vector<8x8x128xbf16> to vector<64x128xbf16>
    %c16 = arith.constant 16 : index
    %c0_200 = arith.constant 0 : index
    %c0_201 = arith.constant 0 : index
    %221 = vector.load %arg3[%c16, %c0_200, %c0_201] : memref<25x128x128xbf16, #tpu.memory_space<vmem>>, vector<1x128x128xbf16>
    %222 = vector.shape_cast %221 : vector<1x128x128xbf16> to vector<128x128xbf16>
    %cst_202 = arith.constant dense<0.000000e+00> : vector<64x128xf32>
    %223 = tpu.matmul %220, %222, %cst_202 {dimension_numbers = #tpu.dot_dimension_numbers<[1], [0], [0], [1], [0, 0, 1, 1], [], []>} : vector<64x128xbf16>, vector<128x128xbf16>, vector<64x128xf32> -> vector<64x128xf32>
    %224 = arith.addf %217, %223 : vector<64x128xf32>
    %c1_203 = arith.constant 1 : index
    %c1_204 = arith.constant 1 : index
    %c0_205 = arith.constant 0 : index
    %c0_206 = arith.constant 0 : index
    %225 = vector.load %arg6[%c1_203, %c1_204, %c0_205, %c0_206] : memref<3x10x8x128xbf16, #tpu.memory_space<vmem>>, vector<1x8x8x128xbf16>
    %226 = vector.shape_cast %225 : vector<1x8x8x128xbf16> to vector<8x8x128xbf16>
    %227 = vector.shape_cast %226 : vector<8x8x128xbf16> to vector<64x128xbf16>
    %c18 = arith.constant 18 : index
    %c0_207 = arith.constant 0 : index
    %c0_208 = arith.constant 0 : index
    %228 = vector.load %arg3[%c18, %c0_207, %c0_208] : memref<25x128x128xbf16, #tpu.memory_space<vmem>>, vector<1x128x128xbf16>
    %229 = vector.shape_cast %228 : vector<1x128x128xbf16> to vector<128x128xbf16>
    %cst_209 = arith.constant dense<0.000000e+00> : vector<64x128xf32>
    %230 = tpu.matmul %227, %229, %cst_209 {dimension_numbers = #tpu.dot_dimension_numbers<[1], [0], [0], [1], [0, 0, 1, 1], [], []>} : vector<64x128xbf16>, vector<128x128xbf16>, vector<64x128xf32> -> vector<64x128xf32>
    %231 = arith.addf %224, %230 : vector<64x128xf32>
    %232 = vector.broadcast %23 : vector<1x128xf32> to vector<64x128xf32>
    %233 = arith.addf %231, %232 : vector<64x128xf32>
    %cst_210 = arith.constant 0.000000e+00 : f32
    %234 = vector.broadcast %cst_210 : f32 to vector<64x128xf32>
    %235 = arith.cmpf ogt, %233, %234 : vector<64x128xf32>
    %cst_211 = arith.constant -4.190000e-01 : f32
    %236 = vector.broadcast %cst_211 : f32 to vector<64x128xf32>
    %237 = arith.mulf %233, %236 : vector<64x128xf32>
    %238 = arith.select %235, %233, %237 : vector<64x128xi1>, vector<64x128xf32>
    %239 = vector.shape_cast %238 : vector<64x128xf32> to vector<8x8x128xf32>
    %240 = vector.extract_strided_slice %239 {offsets = [0, 0, 0], sizes = [7, 8, 128], strides = [1, 1, 1]} : vector<8x8x128xf32> to vector<7x8x128xf32>
    %cst_212 = arith.constant dense<0.000000e+00> : vector<8x128xf32>
    %241 = vector.multi_reduction <add>, %240, %cst_212 [0] : vector<7x8x128xf32> to vector<8x128xf32>
    %242 = vector.extract_strided_slice %241 {offsets = [0, 0], sizes = [7, 128], strides = [1, 1]} : vector<8x128xf32> to vector<7x128xf32>
    %cst_213 = arith.constant dense<0.000000e+00> : vector<128xf32>
    %243 = vector.multi_reduction <add>, %242, %cst_213 [0] : vector<7x128xf32> to vector<128xf32>
    %244 = vector.shape_cast %243 : vector<128xf32> to vector<1x128xf32>
    %245 = arith.addf %204, %244 : vector<1x128xf32>
    %c0_214 = arith.constant 0 : index
    %c0_215 = arith.constant 0 : index
    %c0_216 = arith.constant 0 : index
    %246 = vector.load %arg5[%c0_214, %c0_215, %c0_216] : memref<1x1x128xf32, #tpu.memory_space<vmem>>, vector<1x1x128xf32>
    %247 = vector.shape_cast %246 : vector<1x1x128xf32> to vector<128xf32>
    %248 = vector.shape_cast %245 : vector<1x128xf32> to vector<128xf32>
    %249 = arith.addf %247, %248 : vector<128xf32>
    %c0_217 = arith.constant 0 : index
    %c0_218 = arith.constant 0 : index
    %c0_219 = arith.constant 0 : index
    %250 = vector.load %arg5[%c0_217, %c0_218, %c0_219] : memref<1x1x128xf32, #tpu.memory_space<vmem>>, vector<1x1x128xf32>
    %251 = vector.shape_cast %250 : vector<1x1x128xf32> to vector<128xf32>
    %252 = vector.shape_cast %249 : vector<128xf32> to vector<1x1x128xf32>
    tpu.vector_store %arg5[%c0_217, %c0_218, %c0_219], %252 {strides = array<i32>} : memref<1x1x128xf32, #tpu.memory_space<vmem>>, vector<1x1x128xf32>,
    %c0_i32_220 = arith.constant 0 : i32
    %253 = arith.cmpi eq, %arg1, %c0_i32_220 : i32
    %254 = arith.extui %253 : i1 to i32
    %c0_i32_221 = arith.constant 0 : i32
    %255 = arith.cmpi ne, %254, %c0_i32_221 : i32
    scf.if %255 {
      %c0_222 = arith.constant 0 : index
      %c0_223 = arith.constant 0 : index
      %c0_224 = arith.constant 0 : index
      %256 = vector.load %arg5[%c0_222, %c0_223, %c0_224] : memref<1x1x128xf32, #tpu.memory_space<vmem>>, vector<1x1x128xf32>
      %257 = vector.shape_cast %256 : vector<1x1x128xf32> to vector<128xf32>
      %cst_225 = arith.constant 0.00444444455 : f32
      %258 = vector.broadcast %cst_225 : f32 to vector<128xf32>
      %259 = arith.mulf %257, %258 : vector<128xf32>
      %c0_226 = arith.constant 0 : index
      %c0_227 = arith.constant 0 : index
      %c0_228 = arith.constant 0 : index
      %260 = vector.load %arg5[%c0_226, %c0_227, %c0_228] : memref<1x1x128xf32, #tpu.memory_space<vmem>>, vector<1x1x128xf32>
      %261 = vector.shape_cast %260 : vector<1x1x128xf32> to vector<128xf32>
      %262 = vector.shape_cast %259 : vector<128xf32> to vector<1x1x128xf32>
      tpu.vector_store %arg5[%c0_226, %c0_227, %c0_228], %262 {strides = array<i32>} : memref<1x1x128xf32, #tpu.memory_space<vmem>>, vector<1x1x128xf32>,
    } else {
    }
    return
  }
  func.func @transform_0(%arg0: i32, %arg1: i32) -> (i32, i32, i32, i32) {
    %c0_i32 = arith.constant 0 : i32
    %c0_i32_0 = arith.constant 0 : i32
    %c0_i32_1 = arith.constant 0 : i32
    %c0_i32_2 = arith.constant 0 : i32
    return %arg0, %c0_i32, %c0_i32_0, %c0_i32_1 : i32, i32, i32, i32
  }
  func.func @transform_1(%arg0: i32, %arg1: i32) -> (i32, i32, i32) {
    %c0_i32 = arith.constant 0 : i32
    %c0_i32_0 = arith.constant 0 : i32
    %c0_i32_1 = arith.constant 0 : i32
    %c0_i32_2 = arith.constant 0 : i32
    return %c0_i32, %c0_i32_0, %c0_i32_1 : i32, i32, i32
  }
  func.func @transform_2(%arg0: i32, %arg1: i32) -> (i32, i32) {
    %c0_i32 = arith.constant 0 : i32
    %c0_i32_0 = arith.constant 0 : i32
    %c0_i32_1 = arith.constant 0 : i32
    return %c0_i32, %c0_i32_0 : i32, i32
  }
  func.func @transform_3(%arg0: i32, %arg1: i32) -> (i32, i32, i32) {
    %c0_i32 = arith.constant 0 : i32
    %c0_i32_0 = arith.constant 0 : i32
    %c0_i32_1 = arith.constant 0 : i32
    return %arg0, %c0_i32, %c0_i32_0 : i32, i32, i32
  }
}

</mosaic_0001>

<bundles_post_ra>
// kernel: conv_transpose_leaky_gap.1
= control target key start
LH: loop header
LB: loop body
LE: loop exit
PB: predicated region body
PF: predicated region fallthrough
CT: control target
= control target key end

     0   :  { %s5196_s12 = smov 0   ;;  %s5198_s13 = smov 0   ;;  %s6269_s0 = inlined_call_operand.vmem [shape: bf16[2,10,10,128], index: 0, kind: input, shape index: {}]   ;;  %s6270_s1 = inlined_call_operand.vmem [shape: bf16[25,128,128], index: 1, kind: input, shape index: {}]   ;;  %s6271_s2 = inlined_call_operand.vmem [shape: f32[1,128], index: 2, kind: input, shape index: {}]   ;;  %s6272_s3 = inlined_call_operand.vmem [shape: f32[2,1,128], index: 3, kind: output, shape index: {}]  }
   0x1   :  { %s5200_s14 = smov 0  }
   0x2 LB: > { %s25_s15 = sadd.s32 1, %s5169_s13  ;;  %p3509_p0 = scmp.ge.s32.totalorder %s5173_s14, 1  ;;  %s5173_s14 = sphi %s5200_s14, %s13_s14   ;;  %s5169_s13 = sphi %s5198_s13, %s6278_s13   ;;  %s5165_s12 = sphi %s5196_s12, %s6277_s12  }
   0x3   : > { %p27_p1 = scmp.ge.s32.totalorder %s25_s15, 2  ;;  %p149_p2 = scmp.lt.s32.totalorder %s5173_s14, 3 }
   0x5   : > { %s6280_s15 = smov (%p27_p1, %s25_s15), 0  ;;  %p150_p3 = pnand %p3509_p0, %p149_p2 }
   0x6   : > { %p171_p4 = scmp.lt.s32.totalorder (!%p150_p3), %s5165_s12, 1 }
   0x7   : > { %153 = sbr.rel (%p150_p3) target bundleno = 611 (0x263), region = 32 }
   0xc   : > { %v4874_v0 = vld [vmem:[%s6270_s1 + $0xb8] sm:$0xff]  ;;  %v4873_v2 = vld [vmem:[%s6270_s1 + $0xb0] sm:$0xff]  ;;  %s6282_s12 = smov (!%p171_p4, %s5165_s12), 1  ;;  %v4872_v6 = vld [vmem:[%s6270_s1 + $0xa8] sm:$0xff]  ;;  %vm228_vm0 = vsmask.f32 3328 }
   0xd   : > { %v4886_v1 = vld [vmem:[%s6270_s1 + $0x138] sm:$0xff]  ;;  %620 = vmatpush.bf16.msra.mxu0 %v4874_v0  ;;  %5087 = vmatpush.bf16.msra.mxu1 %v4874_v0  ;;  %v4885_v3 = vld [vmem:[%s6270_s1 + $0x130] sm:$0xff]  ;;  %s5103_s26 = smul.u32 80, %s6282_s12  ;;  %v4884_v7 = vld [vmem:[%s6270_s1 + $0x128] sm:$0xff]  ;;  %vm229_vm1 = vsmask.f32 7440  ;;  %s6248_s16 = scalar_lea.vmem %s6272_s3, %s6282_s12 }
   0xe   : > { %848 = vmatpush.bf16.msra.mxu2 %v4886_v1  ;;  %v4898_v4 = vld [vmem:[%s6270_s1 + $0x2b8] sm:$0xff]  ;;  %v4897_v5 = vld [vmem:[%s6270_s1 + $0x2b0] sm:$0xff]  ;;  %v4896_v8 = vld [vmem:[%s6270_s1 + $0x2a8] sm:$0xff]  ;;  %vm432_vm3 = vcmask 1042432   ;;  %vm433_vm4 = vcmask 1046532  }
   0xf   : > { %983 = vmatpush.bf16.msra.mxu3 %v4898_v4  ;;  %s5244_s8 = scalar_lea.vmem %s6269_s0, %s5103_s26  ;;  %v4871_v12 = vld [vmem:[%s6270_s1 + $0xa0] sm:$0xff]  ;;  %v4870_v37 = vld [vmem:[%s6270_s1 + $0x98] sm:$0xff]  ;;  %vm5268_vm2 = vmor %vm228_vm0, %vm229_vm1 }
  0x10   : > { %v212_v9 = vld [vmem:[%s5244_s8 + $0x10] sm:$0xf]  ;;  %v213_v10 = vld [vmem:[%s5244_s8 + $0x14] sm:$0x1]  ;;  %v214_v11 = vld [vmem:[%s5244_s8 + $0x18] sm:$0xf] }
  0x11   : > { %621 = vmatpush.bf16.msra.mxu0 %v4873_v2  ;;  %5088 = vmatpush.bf16.msra.mxu1 %v4873_v2  ;;  %v215_v13 = vld [vmem:[%s5244_s8 + $0x1c] sm:$0x1]  ;;  %v260_v14 = vshrl.u32 %v212_v9, 16  ;;  %v263_v15 = vshll.u32 %v212_v9, 16  ;;  %v269_v16 = vshll.u32 %v213_v10, 16  ;;  %v274_v17 = vshrl.u32 %v214_v11, 16  ;;  %vm5345_vm5 = vmor %vm432_vm3, %vm433_vm4 }
  0x12   : > { %849 = vmatpush.bf16.msra.mxu2 %v4885_v3  ;;  %v4883_v18 = vld [vmem:[%s6270_s1 + $0x120] sm:$0xff]  ;;  %v277_v19 = vshll.u32 %v214_v11, 16  ;;  %v283_v20 = vshll.u32 %v215_v13, 16  ;;  %v220_v21 = vld [vmem:[%s5244_s8 + $0x30] sm:$0xf]  ;;  %v4882_v44 = vld [vmem:[%s6270_s1 + $0x118] sm:$0xff] }
  0x13   : > { %984 = vmatpush.bf16.msra.mxu3 %v4897_v5  ;;  %v221_v22 = vld [vmem:[%s5244_s8 + $0x34] sm:$0x1]  ;;  %v262_v23 = vrot.slane %v260_v14, 4  ;;  %v265_v24 = vrot.slane %v263_v15, 5  ;;  %v271_v25 = vrot.slane %v269_v16, 5  ;;  %v276_v26 = vrot.slane %v274_v17, 4 }
  0x14   : > { %v222_v27 = vld [vmem:[%s5244_s8 + $0x38] sm:$0xf]  ;;  %v279_v28 = vrot.slane %v277_v19, 5  ;;  %v285_v29 = vrot.slane %v283_v20, 5  ;;  %v223_v30 = vld [vmem:[%s5244_s8 + $0x3c] sm:$0x1] }
  0x15   : > { %622 = vmatpush.bf16.msra.mxu0 %v4872_v6  ;;  %5089 = vmatpush.bf16.msra.mxu1 %v4872_v6  ;;  %v316_v31 = vshrl.u32 %v220_v21, 16  ;;  %v319_v32 = vshll.u32 %v220_v21, 16  ;;  %v266_v33 = vor.u32 %v265_v24, %v262_v23  ;;  %v325_v34 = vshll.u32 %v221_v22, 16  ;;  %v4895_v43 = vld [vmem:[%s6270_s1 + $0x2a0] sm:$0xff]  ;;  %v190_v48 = vld [vmem:[%s5244_s8 + $0x10] sm:$0xf] }
  0x16   : > { %850 = vmatpush.bf16.msra.mxu2 %v4884_v7  ;;  %v330_v35 = vshrl.u32 %v222_v27, 16  ;;  %v333_v36 = vshll.u32 %v222_v27, 16  ;;  %v280_v39 = vor.u32 %v279_v28, %v276_v26  ;;  %v339_v42 = vshll.u32 %v223_v30, 16  ;;  %v191_v52 = vld [vmem:[%s5244_s8 + $0x18] sm:$0xf]  ;;  %v4869_v56 = vld [vmem:[%s6270_s1 + $0x90] sm:$0xff] }
  0x17   : > { %985 = vmatpush.bf16.msra.mxu3 %v4896_v8  ;;  %v318_v40 = vrot.slane %v316_v31, 4  ;;  %v321_v41 = vrot.slane %v319_v32, 5  ;;  %v267_v45 = vrot.slane %v266_v33, 4  ;;  %v327_v51 = vrot.slane %v325_v34, 5  ;;  %200 = vst [vmem:[#allocation2 + $0x8] sm:$0xf] %v190_v48 }
  0x18   : > { %v332_v46 = vrot.slane %v330_v35, 4  ;;  %v335_v47 = vrot.slane %v333_v36, 5  ;;  %v281_v49 = vrot.slane %v280_v39, 4  ;;  %v341_v55 = vrot.slane %v339_v42, 5  ;;  %201 = vst [vmem:[#allocation2 + $0xc] sm:$0xf] %v191_v52 }
  0x19   : > { %623 = vmatpush.bf16.msra.mxu0 %v4871_v12  ;;  %5090 = vmatpush.bf16.msra.mxu1 %v4871_v12  ;;  %v322_v50 = vor.u32 %v321_v41, %v318_v40  ;;  %v272_v53 = vsel %vm5268_vm2, %v267_v45, %v271_v25  ;;  %v4894_v59 = vld [vmem:[%s6270_s1 + $0x298] sm:$0xff]  ;;  %v4881_v60 = vld [vmem:[%s6270_s1 + $0x110] sm:$0xff]  ;;  %v216_v62 = vld [vmem:[%s5244_s8 + $0x20] sm:$0xf] }
  0x1a   : > { %851 = vmatpush.bf16.msra.mxu2 %v4883_v18  ;;  %v336_v54 = vor.u32 %v335_v47, %v332_v46  ;;  %v286_v57 = vsel %vm5268_vm2, %v281_v49, %v285_v29  ;;  %384 = vst [vmem:[#allocation2 + $0x30] sm:$0xf] %v272_v53  ;;  %v217_v0 = vld [vmem:[%s5244_s8 + $0x24] sm:$0x1]  ;;  %v218_v1 = vld [vmem:[%s5244_s8 + $0x28] sm:$0xf] }
  0x1b   : > { %v323_v58 = vrot.slane %v322_v50, 4  ;;  %986 = vmatpush.bf16.msra.mxu3 %v4895_v43  ;;  %385 = vst [vmem:[#allocation2 + $0x34] sm:$0xf] %v286_v57  ;;  %v219_v2 = vld [vmem:[%s5244_s8 + $0x2c] sm:$0x1]  ;;  %v288_v5 = vshrl.u32 %v216_v62, 16 }
  0x1c   : > { %v337_v61 = vrot.slane %v336_v54, 4  ;;  %v4868_v3 = vld [vmem:[%s6270_s1 + $0x88] sm:$0xff]  ;;  %v291_v6 = vshll.u32 %v216_v62, 16  ;;  %v297_v7 = vshll.u32 %v217_v0, 16  ;;  %v4893_v8 = vld [vmem:[%s6270_s1 + $0x290] sm:$0xff]  ;;  %v302_v9 = vshrl.u32 %v218_v1, 16 }
  0x1d   : > { %624 = vmatpush.bf16.msra.mxu0 %v4870_v37  ;;  %5091 = vmatpush.bf16.msra.mxu1 %v4870_v37  ;;  %v328_v63 = vsel %vm5268_vm2, %v323_v58, %v327_v51  ;;  %v305_v10 = vshll.u32 %v218_v1, 16  ;;  %v311_v11 = vshll.u32 %v219_v2, 16  ;;  %v4880_v12 = vld [vmem:[%s6270_s1 + $0x108] sm:$0xff]  ;;  %v290_v13 = vrot.slane %v288_v5, 4  ;;  %v224_v15 = vld [vmem:[%s5244_s8 + $0x40] sm:$0xf] }
  0x1e   : > { %852 = vmatpush.bf16.msra.mxu2 %v4882_v44  ;;  %v342_v4 = vsel %vm5268_vm2, %v337_v61, %v341_v55  ;;  %388 = vst [vmem:[#allocation2 + $0x40] sm:$0xf] %v328_v63  ;;  %v293_v14 = vrot.slane %v291_v6, 5  ;;  %v299_v16 = vrot.slane %v297_v7, 5  ;;  %v304_v17 = vrot.slane %v302_v9, 4  ;;  %v4867_v21 = vld [vmem:[%s6270_s1 + $0x80] sm:$0xff] }
  0x1f   : > { %389 = vst [vmem:[#allocation2 + $0x44] sm:$0xf] %v342_v4  ;;  %987 = vmatpush.bf16.msra.mxu3 %v4894_v59  ;;  %v307_v18 = vrot.slane %v305_v10, 5  ;;  %v313_v19 = vrot.slane %v311_v11, 5  ;;  %v225_v20 = vld [vmem:[%s5244_s8 + $0x44] sm:$0x1] }
  0x20   : > { %v294_v22 = vor.u32 %v293_v14, %v290_v13  ;;  %v226_v23 = vld [vmem:[%s5244_s8 + $0x48] sm:$0xf]  ;;  %v227_v24 = vld [vmem:[%s5244_s8 + $0x4c] sm:$0x1]  ;;  %v344_v25 = vshrl.u32 %v224_v15, 16  ;;  %v347_v26 = vshll.u32 %v224_v15, 16 }
  0x21   : > { %625 = vmatpush.bf16.msra.mxu0 %v4869_v56  ;;  %5092 = vmatpush.bf16.msra.mxu1 %v4869_v56  ;;  %v4862_v27 = vld [vmem:[%s6270_s1 + $0x38] sm:$0xff]  ;;  %v4892_v29 = vld [vmem:[%s6270_s1 + $0x288] sm:$0xff]  ;;  %v308_v30 = vor.u32 %v307_v18, %v304_v17  ;;  %v353_v31 = vshll.u32 %v225_v20, 16  ;;  %v358_v32 = vshrl.u32 %v226_v23, 16  ;;  %v361_v33 = vshll.u32 %v226_v23, 16  ;;  %v4879_v35 = vld [vmem:[%s6270_s1 + $0x100] sm:$0xff] }
  0x22   : > { %853 = vmatpush.bf16.msra.mxu2 %v4881_v60  ;;  %v4910_v28 = vld [vmem:[%s6270_s1 + $0x338] sm:$0xff]  ;;  %v394_v34 = vld [vmem:[%s5244_s8 + $0x8] sm:$0xe]  ;;  %v295_v36 = vrot.slane %v294_v22, 4  ;;  %v346_v37 = vrot.slane %v344_v25, 4  ;;  %v349_v39 = vrot.slane %v347_v26, 5 }
  0x23   : > { %988 = vmatpush.bf16.msra.mxu3 %v4893_v8  ;;  %v367_v40 = vshll.u32 %v227_v24, 16  ;;  %v395_v41 = vld [vmem:[%s5244_s8 + $0xc] sm:$0x1]  ;;  %v309_v42 = vrot.slane %v308_v30, 4  ;;  %v355_v43 = vrot.slane %v353_v31, 5  ;;  %v360_v44 = vrot.slane %v358_v32, 4 }
  0x24   : > { %v363_v45 = vrot.slane %v361_v33, 5  ;;  %v396_v46 = vld [vmem:[%s5244_s8 + $0x10] sm:$0xe]  ;;  %v4934_v49 = vld [vmem:[%s6270_s1 + $0x538] sm:$0xff]  ;;  %v300_v50 = vsel %vm5268_vm2, %v295_v36, %v299_v16  ;;  %v350_v51 = vor.u32 %v349_v39, %v346_v37  ;;  %v397_v53 = vld [vmem:[%s5244_s8 + $0x14] sm:$0x1] }
  0x25   : > { %626 = vmatpush.bf16.msra.mxu0 %v4868_v3  ;;  %5093 = vmatpush.bf16.msra.mxu1 %v4868_v3  ;;  %v5332_v47 = vld [vmem:[#allocation2 + $0x30] sm:$0xff]  ;;  %v369_v52 = vrot.slane %v367_v40, 5  ;;  %v314_v54 = vsel %vm5268_vm2, %v309_v42, %v313_v19  ;;  %386 = vst [vmem:[#allocation2 + $0x38] sm:$0xf] %v300_v50  ;;  %v3512_v57 = vrot.slane %v394_v34, 9  ;;  %v441_v58 = vrot.slane %v395_v41, 5 }
  0x26   : > { %854 = vmatpush.bf16.msra.mxu2 %v4880_v12  ;;  %v5334_v48 = vld [vmem:[#allocation2 + $0x40] sm:$0xff]  ;;  %v364_v55 = vor.u32 %v363_v45, %v360_v44  ;;  %387 = vst [vmem:[#allocation2 + $0x3c] sm:$0xf] %v314_v54  ;;  %v351_v60 = vrot.slane %v350_v51, 4  ;;  %v3513_v62 = vrot.slane %v396_v46, 9  ;;  %v445_v63 = vrot.slane %v397_v53, 5 }
  0x27   : > { %989 = vmatpush.bf16.msra.mxu3 %v4892_v29  ;;  %v192_v59 = vld [vmem:[%s5244_s8 + $0x20] sm:$0xf]  ;;  %v4861_v0 = vld [vmem:[%s6270_s1 + $0x30] sm:$0xff]  ;;  %v442_v3 = vsel %vm5345_vm5, %v3512_v57, %v441_v58  ;;  %v4875_v4 = vld [vmem:[#allocation2 + $0x8] sm:$0xff] }
  0x28   : > { %v4891_v61 = vld [vmem:[%s6270_s1 + $0x280] sm:$0xff]  ;;  %v4909_v1 = vld [vmem:[%s6270_s1 + $0x330] sm:$0xff]  ;;  %v365_v2 = vrot.slane %v364_v55, 4  ;;  %202 = vst [vmem:[#allocation2 + $0x10] sm:$0xf] %v192_v59  ;;  %v356_v5 = vsel %vm5268_vm2, %v351_v60, %v355_v43  ;;  %v446_v6 = vsel %vm5345_vm5, %v3513_v62, %v445_v63  ;;  %v4946_v7 = vld [vmem:[%s6270_s1 + $0x5b8] sm:$0xff] }
  0x29   : > { %627 = vmatpush.bf16.msra.mxu0 %v4867_v21  ;;  %5094 = vmatpush.bf16.msra.mxu1 %v4867_v21  ;;  %487 = vst [vmem:[#allocation2 + $0x54] sm:$0xf] %v442_v3  ;;  %v4860_v8 = vld [vmem:[%s6270_s1 + $0x28] sm:$0xff]  ;;  %v398_v12 = vld [vmem:[%s5244_s8 + $0x18] sm:$0xe]  ;;  %v4933_v13 = vld [vmem:[%s6270_s1 + $0x530] sm:$0xff] }
  0x2a   : > { %855 = vmatpush.bf16.msra.mxu2 %v4879_v35  ;;  %v4908_v9 = vld [vmem:[%s6270_s1 + $0x328] sm:$0xff]  ;;  %v370_v10 = vsel %vm5268_vm2, %v365_v2, %v369_v52  ;;  %390 = vst [vmem:[#allocation2 + $0x48] sm:$0xf] %v356_v5  ;;  %v399_v14 = vld [vmem:[%s5244_s8 + $0x1c] sm:$0x1]  ;;  %v3514_v15 = vrot.slane %v398_v12, 9 }
  0x2b   : > { %v193_v11 = vld [vmem:[%s5244_s8 + $0x28] sm:$0xf]  ;;  %391 = vst [vmem:[#allocation2 + $0x4c] sm:$0xf] %v370_v10  ;;  %990 = vmatpush.bf16.msra.mxu3 %v4891_v61  ;;  %v449_v16 = vrot.slane %v399_v14, 5  ;;  %v4945_v18 = vld [vmem:[%s6270_s1 + $0x5b0] sm:$0xff] }
  0x2c   : > { %628 = vmatmul.bf16.vlgmr.msra.gmra.mxu0 %v5332_v47  ;;  %638 = vmatmul.bf16.vlgmr.msra.gmra.mxu1 %v5334_v48  ;;  %488 = vst [vmem:[#allocation2 + $0x58] sm:$0xf] %v446_v6  ;;  %v210_v17 = vld [vmem:[%s5244_s8 + $0x8] sm:$0xf]  ;;  %v211_v19 = vld [vmem:[%s5244_s8 + $0xc] sm:$0x1] }
  0x2d   : > { %721 = vmatpush.bf16.msrb.mxu1 %v4862_v27  ;;  %1118 = vmatpush.bf16.msrb.mxu0 %v4910_v28  ;;  %203 = vst [vmem:[#allocation2 + $0x14] sm:$0xf] %v193_v11  ;;  %v246_v20 = vshrl.u32 %v210_v17, 16  ;;  %v249_v21 = vshll.u32 %v210_v17, 16  ;;  %v4859_v22 = vld [vmem:[%s6270_s1 + $0x20] sm:$0xff]  ;;  %v4932_v23 = vld [vmem:[%s6270_s1 + $0x528] sm:$0xff]  ;;  %v450_v24 = vsel %vm5345_vm5, %v3514_v15, %v449_v16 }
  0x2e   : > { %1387 = vmatpush.bf16.msrb.mxu2 %v4934_v49  ;;  %v255_v25 = vshll.u32 %v211_v19, 16  ;;  %v400_v26 = vld [vmem:[%s5244_s8 + $0x20] sm:$0xe]  ;;  %v401_v27 = vld [vmem:[%s5244_s8 + $0x24] sm:$0x1]  ;;  %v4944_v40 = vld [vmem:[%s6270_s1 + $0x5a8] sm:$0xff] }
  0x2f   : > { %856 = vmatmul.bf16.vlgmr.msra.gmra.mxu2 %v4875_v4  ;;  %1521 = vmatpush.bf16.msrb.mxu3 %v4946_v7  ;;  %489 = vst [vmem:[#allocation2 + $0x5c] sm:$0xf] %v450_v24  ;;  %v248_v28 = vrot.slane %v246_v20, 4  ;;  %v251_v29 = vrot.slane %v249_v21, 5  ;;  %v3515_v30 = vrot.slane %v400_v26, 9  ;;  %v453_v31 = vrot.slane %v401_v27, 5 }
  0x30   : > { %v4907_v32 = vld [vmem:[%s6270_s1 + $0x320] sm:$0xff]  ;;  %v194_v33 = vld [vmem:[%s5244_s8 + $0x30] sm:$0xf]  ;;  %v195_v34 = vld [vmem:[%s5244_s8 + $0x38] sm:$0xf]  ;;  %v257_v36 = vrot.slane %v255_v25, 5 }
  0x31   : > { %722 = vmatpush.bf16.msrb.mxu1 %v4861_v0  ;;  %1119 = vmatpush.bf16.msrb.mxu0 %v4909_v1  ;;  %v252_v35 = vor.u32 %v251_v29, %v248_v28  ;;  %v454_v37 = vsel %vm5345_vm5, %v3515_v30, %v453_v31  ;;  %204 = vst [vmem:[#allocation2 + $0x18] sm:$0xf] %v194_v33  ;;  %v4931_v39 = vld [vmem:[%s6270_s1 + $0x520] sm:$0xff]  ;;  %v402_v41 = vld [vmem:[%s5244_s8 + $0x28] sm:$0xe]  ;;  %v4858_v45 = vld [vmem:[%s6270_s1 + $0x18] sm:$0xff] }
  0x32   : > { %1388 = vmatpush.bf16.msrb.mxu2 %v4933_v13  ;;  %490 = vst [vmem:[#allocation2 + $0x60] sm:$0xf] %v454_v37  ;;  %v403_v44 = vld [vmem:[%s5244_s8 + $0x2c] sm:$0x1]  ;;  %v4906_v46 = vld [vmem:[%s6270_s1 + $0x318] sm:$0xff]  ;;  %v3516_v49 = vrot.slane %v402_v41, 9 }
  0x33   : > { %1522 = vmatpush.bf16.msrb.mxu3 %v4945_v18  ;;  %v5413_v42 = vld [vmem:[#allocation2 + $0x54] sm:$0xff]  ;;  %v253_v43 = vrot.slane %v252_v35, 4  ;;  %205 = vst [vmem:[#allocation2 + $0x1c] sm:$0xf] %v195_v34  ;;  %v457_v50 = vrot.slane %v403_v44, 5  ;;  %v5429_v57 = vld [vmem:[#allocation2 + $0x48] sm:$0xff] }
  0x34   : > { %v404_v51 = vld [vmem:[%s5244_s8 + $0x30] sm:$0xe]  ;;  %v5423_v52 = vld [vmem:[#allocation2 + $0x38] sm:$0xff]  ;;  %991 = vmatmul.bf16.vlgmr.msra.gmra.mxu3 %v5413_v42  ;;  %v405_v54 = vld [vmem:[%s5244_s8 + $0x34] sm:$0x1] }
  0x35   : > { %723 = vmatpush.bf16.msrb.mxu1 %v4860_v8  ;;  %1120 = vmatpush.bf16.msrb.mxu0 %v4908_v9  ;;  %v258_v53 = vsel %vm5268_vm2, %v253_v43, %v257_v36  ;;  %v3517_v55 = vrot.slane %v404_v51, 9  ;;  %v458_v58 = vsel %vm5345_vm5, %v3516_v49, %v457_v50  ;;  %v461_v59 = vrot.slane %v405_v54, 5  ;;  %v196_v60 = vld [vmem:[%s5244_s8 + $0x40] sm:$0xf]  ;;  %v4930_v61 = vld [vmem:[%s6270_s1 + $0x518] sm:$0xff]  ;;  %v4857_v63 = vld [vmem:[%s6270_s1 + $0x10] sm:$0xff] }
  0x36   : > { %1389 = vmatpush.bf16.msrb.mxu2 %v4932_v23  ;;  %383 = vst [vmem:[#allocation2 + $0x2c] sm:$0xf] %v258_v53  ;;  %v197_v62 = vld [vmem:[%s5244_s8 + $0x48] sm:$0xf]  ;;  %v4905_v0 = vld [vmem:[%s6270_s1 + $0x310] sm:$0xff]  ;;  %v4943_v3 = vld [vmem:[%s6270_s1 + $0x5a0] sm:$0xff] }
  0x37   : > { %1523 = vmatpush.bf16.msrb.mxu3 %v4944_v40  ;;  %491 = vst [vmem:[#allocation2 + $0x64] sm:$0xf] %v458_v58  ;;  %v462_v1 = vsel %vm5345_vm5, %v3517_v55, %v461_v59  ;;  %v4876_v2 = vld [vmem:[#allocation2 + $0x10] sm:$0xff]  ;;  %v4856_v4 = vld [vmem:[%s6270_s1 + $0x8] sm:$0xff]  ;;  %v4942_v7 = vld [vmem:[%s6270_s1 + $0x598] sm:$0xff] }
  0x38   : > { %206 = vst [vmem:[#allocation2 + $0x20] sm:$0xf] %v196_v60  ;;  %v4904_v5 = vld [vmem:[%s6270_s1 + $0x308] sm:$0xff]  ;;  %v4929_v6 = vld [vmem:[%s6270_s1 + $0x510] sm:$0xff]  ;;  %v406_v9 = vld [vmem:[%s5244_s8 + $0x38] sm:$0xe] }
  0x39   : > { %724 = vmatpush.bf16.msrb.mxu1 %v4859_v22  ;;  %1121 = vmatpush.bf16.msrb.mxu0 %v4907_v32  ;;  %492 = vst [vmem:[#allocation2 + $0x68] sm:$0xf] %v462_v1  ;;  %v4928_v8 = vld [vmem:[%s6270_s1 + $0x508] sm:$0xff]  ;;  %v407_v10 = vld [vmem:[%s5244_s8 + $0x3c] sm:$0x1]  ;;  %v4855_v11 = vld [vmem:[%s6270_s1] sm:$0xff] }
  0x3a   : > { %1390 = vmatpush.bf16.msrb.mxu2 %v4931_v39  ;;  %207 = vst [vmem:[#allocation2 + $0x24] sm:$0xf] %v197_v62  ;;  %v4903_v12 = vld [vmem:[%s6270_s1 + $0x300] sm:$0xff]  ;;  %v4922_v13 = vld [vmem:[%s6270_s1 + $0x3b8] sm:$0xff]  ;;  %v3518_v14 = vrot.slane %v406_v9, 9  ;;  %v465_v15 = vrot.slane %v407_v10, 5 }
  0x3b   : > { %1524 = vmatpush.bf16.msrb.mxu3 %v4943_v3  ;;  %v5477_v16 = vld [vmem:[#allocation2 + $0x5c] sm:$0xff]  ;;  %v409_v18 = vld [vmem:[%s5244_s8 + $0x44] sm:$0x1]  ;;  %v4921_v28 = vld [vmem:[%s6270_s1 + $0x3b0] sm:$0xff] }
  0x3c   : > { %633 = vmatmul.bf16.gmra.mxu0 %v5423_v52  ;;  %643 = vmatmul.bf16.gmra.mxu1 %v5429_v57  ;;  %v408_v17 = vld [vmem:[%s5244_s8 + $0x40] sm:$0xe]  ;;  %v4958_v19 = vld [vmem:[%s6270_s1 + $0x638] sm:$0xff]  ;;  %v466_v20 = vsel %vm5345_vm5, %v3518_v14, %v465_v15  ;;  %v469_v22 = vrot.slane %v409_v18, 5  ;;  %v393_v24 = vld [vmem:[%s5244_s8 + $0x4] sm:$0x1] }
  0x3d   : > { %725 = vmatpush.bf16.msrb.mxu1 %v4858_v45  ;;  %1122 = vmatpush.bf16.msrb.mxu0 %v4906_v46  ;;  %v3519_v21 = vrot.slane %v408_v17, 9  ;;  %493 = vst [vmem:[#allocation2 + $0x6c] sm:$0xf] %v466_v20  ;;  %v392_v23 = vld [vmem:[%s5244_s8] sm:$0xe]  ;;  %v437_v27 = vrot.slane %v393_v24, 5 }
  0x3e   : > { %1391 = vmatpush.bf16.msrb.mxu2 %v4930_v61  ;;  %v3511_v26 = vrot.slane %v392_v23, 9  ;;  %v5494_v29 = vld [vmem:[#allocation2 + $0x58] sm:$0xff]  ;;  %v5496_v30 = vld [vmem:[#allocation2 + $0x2c] sm:$0xff]  ;;  %v4927_v36 = vld [vmem:[%s6270_s1 + $0x500] sm:$0xff] }
  0x3f   : > { %861 = vmatmul.bf16.gmra.mxu2 %v4876_v2  ;;  %1525 = vmatpush.bf16.msrb.mxu3 %v4942_v7  ;;  %v470_v25 = vsel %vm5345_vm5, %v3519_v21, %v469_v22  ;;  %v4957_v32 = vld [vmem:[%s6270_s1 + $0x630] sm:$0xff]  ;;  %v4877_v33 = vld [vmem:[#allocation2 + $0x18] sm:$0xff]  ;;  %v4920_v34 = vld [vmem:[%s6270_s1 + $0x3a8] sm:$0xff] }
  0x40   : > { %494 = vst [vmem:[#allocation2 + $0x70] sm:$0xf] %v470_v25  ;;  %v438_v31 = vsel %vm5345_vm5, %v3511_v26, %v437_v27  ;;  %v4956_v35 = vld [vmem:[%s6270_s1 + $0x628] sm:$0xff]  ;;  %v4941_v37 = vld [vmem:[%s6270_s1 + $0x590] sm:$0xff]  ;;  %v208_v39 = vld [vmem:[%s5244_s8] sm:$0xf] }
  0x41   : > { %726 = vmatpush.bf16.msrb.mxu1 %v4857_v63  ;;  %1123 = vmatpush.bf16.msrb.mxu0 %v4905_v0  ;;  %486 = vst [vmem:[#allocation2 + $0x50] sm:$0xf] %v438_v31  ;;  %v232_v40 = vshrl.u32 %v208_v39, 16  ;;  %v235_v41 = vshll.u32 %v208_v39, 16  ;;  %v4919_v43 = vld [vmem:[%s6270_s1 + $0x3a0] sm:$0xff]  ;;  %v4940_v44 = vld [vmem:[%s6270_s1 + $0x588] sm:$0xff] }
  0x42   : > { %1392 = vmatpush.bf16.msrb.mxu2 %v4929_v6  ;;  %v4966_v45 = vld [vmem:[%s6270_s1 + $0x78] sm:$0xff]  ;;  %v410_v46 = vld [vmem:[%s5244_s8 + $0x48] sm:$0xe]  ;;  %v4955_v51 = vld [vmem:[%s6270_s1 + $0x620] sm:$0xff] }
  0x43   : > { %1526 = vmatpush.bf16.msrb.mxu3 %v4941_v37  ;;  %v234_v49 = vrot.slane %v232_v40, 4  ;;  %v237_v50 = vrot.slane %v235_v41, 5  ;;  %v411_v53 = vld [vmem:[%s5244_s8 + $0x4c] sm:$0x1]  ;;  %v3520_v54 = vrot.slane %v410_v46, 9  ;;  %v5533_v61 = vld [vmem:[#allocation2 + $0x64] sm:$0xff] }
  0x44   : > { %996 = vmatmul.bf16.gmra.mxu3 %v5477_v16  ;;  %v209_v55 = vld [vmem:[%s5244_s8 + $0x4] sm:$0x1]  ;;  %v473_v58 = vrot.slane %v411_v53, 5  ;;  %v4918_v62 = vld [vmem:[%s6270_s1 + $0x398] sm:$0xff]  ;;  %v4916_v7 = vld [vmem:[%s6270_s1 + $0x388] sm:$0xff] }
  0x45   : > { %727 = vmatpush.bf16.msrb.mxu1 %v4856_v4  ;;  %1124 = vmatpush.bf16.msrb.mxu0 %v4904_v5  ;;  %v238_v59 = vor.u32 %v237_v50, %v234_v49  ;;  %v241_v60 = vshll.u32 %v209_v55, 16  ;;  %v4954_v2 = vld [vmem:[%s6270_s1 + $0x618] sm:$0xff]  ;;  %v4917_v4 = vld [vmem:[%s6270_s1 + $0x390] sm:$0xff]  ;;  %v5549_v56 = vld [vmem:[#allocation2 + $0x60] sm:$0xff] }
  0x46   : > { %1393 = vmatpush.bf16.msrb.mxu2 %v4928_v8  ;;  %v474_v63 = vsel %vm5345_vm5, %v3520_v54, %v473_v58  ;;  %v5551_v5 = vld [vmem:[#allocation2 + $0x34] sm:$0xff]  ;;  %v4878_v6 = vld [vmem:[#allocation2 + $0x20] sm:$0xff]  ;;  %v189_v14 = vld [vmem:[%s5244_s8 + $0x8] sm:$0xf] }
  0x47   : > { %1527 = vmatpush.bf16.msrb.mxu3 %v4940_v44  ;;  %v239_v0 = vrot.slane %v238_v59, 4  ;;  %v243_v1 = vrot.slane %v241_v60, 5  ;;  %495 = vst [vmem:[#allocation2 + $0x74] sm:$0xf] %v474_v63  ;;  %v4939_v38 = vld [vmem:[%s6270_s1 + $0x580] sm:$0xff]  ;;  %v4953_v8 = vld [vmem:[%s6270_s1 + $0x610] sm:$0xff] }
  0x48   : > { %v4965_v9 = vld [vmem:[%s6270_s1 + $0x70] sm:$0xff]  ;;  %v4915_v10 = vld [vmem:[%s6270_s1 + $0x380] sm:$0xff]  ;;  %199 = vst [vmem:[#allocation2 + $0x4] sm:$0xf] %v189_v14  ;;  %v4974_v22 = vld [vmem:[%s6270_s1 + $0xf8] sm:$0xff] }
  0x49   : > { %728 = vmatpush.bf16.msrb.mxu1 %v4855_v11  ;;  %1125 = vmatpush.bf16.msrb.mxu0 %v4903_v12  ;;  %v244_v3 = vsel %vm5268_vm2, %v239_v0, %v243_v1  ;;  %v4952_v11 = vld [vmem:[%s6270_s1 + $0x608] sm:$0xff]  ;;  %v4982_v12 = vld [vmem:[%s6270_s1 + $0x2f8] sm:$0xff]  ;;  %v4951_v15 = vld [vmem:[%s6270_s1 + $0x600] sm:$0xff] }
  0x4a   : > { %1394 = vmatpush.bf16.msrb.mxu2 %v4927_v36  ;;  %382 = vst [vmem:[#allocation2 + $0x28] sm:$0xf] %v244_v3  ;;  %v188_v17 = vld [vmem:[%s5244_s8] sm:$0xf]  ;;  %v5584_v18 = vld [vmem:[#allocation2 + $0x6c] sm:$0xff]  ;;  %v4990_v26 = vld [vmem:[%s6270_s1 + $0x378] sm:$0xff] }
  0x4b   : > { %1528 = vmatpush.bf16.msrb.mxu3 %v4939_v38  ;;  %198 = vst [vmem:[#allocation2] sm:$0xf] %v188_v17  ;;  %v5589_v20 = vld [vmem:[#allocation2 + $0x3c] sm:$0xff]  ;;  %v5591_v21 = vld [vmem:[#allocation2 + $0x50] sm:$0xff]  ;;  %v4980_v27 = vld [vmem:[%s6270_s1 + $0x2e8] sm:$0xff] }
  0x4c   : > { %729 = vmatmul.bf16.vlgmr.msrb.gmra.mxu1 %v5494_v29  ;;  %1126 = vmatmul.bf16.vlgmr.msrb.gmra.mxu0 %v5496_v30  ;;  %v4981_v23 = vld [vmem:[%s6270_s1 + $0x2f0] sm:$0xff]  ;;  %v4963_v24 = vld [vmem:[%s6270_s1 + $0x60] sm:$0xff]  ;;  %v4988_v41 = vld [vmem:[%s6270_s1 + $0x368] sm:$0xff] }
  0x4d   : > { %1253 = vmatpush.bf16.msra.mxu1 %v4922_v13  ;;  %1655 = vmatpush.bf16.msra.mxu0 %v4958_v19  ;;  %v4964_v13 = vld [vmem:[%s6270_s1 + $0x68] sm:$0xff]  ;;  %v4973_v25 = vld [vmem:[%s6270_s1 + $0xf0] sm:$0xff]  ;;  %v4979_v37 = vld [vmem:[%s6270_s1 + $0x2e0] sm:$0xff] }
  0x4e   : > { %1899 = vmatpush.bf16.msra.mxu2 %v4966_v45  ;;  %v5587_v19 = vld [vmem:[#allocation2 + $0x68] sm:$0xff]  ;;  %v4989_v36 = vld [vmem:[%s6270_s1 + $0x370] sm:$0xff]  ;;  %v4971_v40 = vld [vmem:[%s6270_s1 + $0xe0] sm:$0xff] }
  0x4f   : > { %866 = vmatmul.bf16.gmra.mxu2 %v4877_v33  ;;  %1993 = vmatpush.bf16.msra.mxu3 %v4982_v12  ;;  %v5622_v33 = vld [vmem:[#allocation2 + $0x44] sm:$0xff]  ;;  %v4961_v39 = vld [vmem:[%s6270_s1 + $0x50] sm:$0xff]  ;;  %v4986_v59 = vld [vmem:[%s6270_s1 + $0x358] sm:$0xff] }
  0x50   : > { %v5650_v44 = vld [vmem:[#allocation2 + $0x30] sm:$0xff]  ;;  %v5653_v45 = vld [vmem:[#allocation2 + $0x4] sm:$0xff]  ;;  %v5006_v1 = vld [vmem:[%s6270_s1 + $0x5f8] sm:$0xff] }
  0x51   : > { %1254 = vmatpush.bf16.msra.mxu1 %v4921_v28  ;;  %1656 = vmatpush.bf16.msra.mxu0 %v4957_v32  ;;  %v4962_v28 = vld [vmem:[%s6270_s1 + $0x58] sm:$0xff]  ;;  %v5617_v31 = vld [vmem:[#allocation2 + $0x28] sm:$0xff]  ;;  %v5620_v32 = vld [vmem:[#allocation2 + $0x70] sm:$0xff] }
  0x52   : > { %1900 = vmatpush.bf16.msra.mxu2 %v4965_v9  ;;  %v4947_v46 = vld [vmem:[#allocation2] sm:$0xff]  ;;  %v4960_v49 = vld [vmem:[%s6270_s1 + $0x48] sm:$0xff]  ;;  %v4977_v55 = vld [vmem:[%s6270_s1 + $0x2d0] sm:$0xff] }
  0x53   : > { %1994 = vmatpush.bf16.msra.mxu3 %v4981_v23  ;;  %v5658_v50 = vld [vmem:[#allocation2 + $0x60] sm:$0xff]  ;;  %v4969_v58 = vld [vmem:[%s6270_s1 + $0xd0] sm:$0xff]  ;;  %v4976_v60 = vld [vmem:[%s6270_s1 + $0x2c8] sm:$0xff] }
  0x54   : > { %1001 = vmatmul.bf16.gmra.mxu3 %v5533_v61  ;;  %v4987_v53 = vld [vmem:[%s6270_s1 + $0x360] sm:$0xff]  ;;  %v5686_v63 = vld [vmem:[#allocation2 + $0xc] sm:$0xff]  ;;  %v5022_v9 = vld [vmem:[%s6270_s1 + $0x1f8] sm:$0xff] }
  0x55   : > { %1255 = vmatpush.bf16.msra.mxu1 %v4920_v34  ;;  %1657 = vmatpush.bf16.msra.mxu0 %v4956_v35  ;;  %v5624_v34 = vld [vmem:[#allocation2 + $0x58] sm:$0xff]  ;;  %v4972_v35 = vld [vmem:[%s6270_s1 + $0xe8] sm:$0xff]  ;;  %v4959_v54 = vld [vmem:[%s6270_s1 + $0x40] sm:$0xff] }
  0x56   : > { %1901 = vmatpush.bf16.msra.mxu2 %v4964_v13  ;;  %v4948_v0 = vld [vmem:[#allocation2 + $0x8] sm:$0xff]  ;;  %v4975_v3 = vld [vmem:[%s6270_s1 + $0x2c0] sm:$0xff]  ;;  %v5005_v38 = vld [vmem:[%s6270_s1 + $0x5f0] sm:$0xff] }
  0x57   : > { %1995 = vmatpush.bf16.msra.mxu3 %v4980_v27  ;;  %v5722_v12 = vld [vmem:[#allocation2 + $0x14] sm:$0xff]  ;;  %v5004_v17 = vld [vmem:[%s6270_s1 + $0x5e8] sm:$0xff]  ;;  %v5741_v27 = vld [vmem:[#allocation2 + $0x1c] sm:$0xff] }
  0x58   : > { %v4949_v13 = vld [vmem:[#allocation2 + $0x10] sm:$0xff] }
  0x59   : > { %1256 = vmatpush.bf16.msra.mxu1 %v4919_v43  ;;  %1658 = vmatpush.bf16.msra.mxu0 %v4955_v51  ;;  %v4978_v43 = vld [vmem:[%s6270_s1 + $0x2d8] sm:$0xff]  ;;  %v5021_v23 = vld [vmem:[%s6270_s1 + $0x1f0] sm:$0xff] }
  0x5a   : > { %1902 = vmatpush.bf16.msra.mxu2 %v4963_v24  ;;  %v4970_v51 = vld [vmem:[%s6270_s1 + $0xd8] sm:$0xff] }
  0x5b   : > { %1996 = vmatpush.bf16.msra.mxu3 %v4979_v37  ;;  %v5014_v37 = vld [vmem:[%s6270_s1 + $0x178] sm:$0xff] }
  0x5c   : > { %734 = vmatmul.bf16.gmra.mxu1 %v5549_v56  ;;  %1131 = vmatmul.bf16.gmra.mxu0 %v5551_v5 }
  0x5d   : > { %1257 = vmatpush.bf16.msra.mxu1 %v4918_v62  ;;  %1659 = vmatpush.bf16.msra.mxu0 %v4954_v2  ;;  %v5683_v62 = vld [vmem:[#allocation2 + $0x38] sm:$0xff]  ;;  %v5691_v2 = vld [vmem:[#allocation2 + $0x68] sm:$0xff] }
  0x5e   : > { %1903 = vmatpush.bf16.msra.mxu2 %v4962_v28  ;;  %v4950_v28 = vld [vmem:[#allocation2 + $0x18] sm:$0xff] }
  0x5f   : > { %871 = vmatmul.bf16.gmra.mxu2 %v4878_v6  ;;  %1997 = vmatpush.bf16.msra.mxu3 %v4978_v43  ;;  %v4985_v6 = vld [vmem:[%s6270_s1 + $0x350] sm:$0xff] }
  0x61   : > { %1258 = vmatpush.bf16.msra.mxu1 %v4917_v4  ;;  %1660 = vmatpush.bf16.msra.mxu0 %v4953_v8  ;;  %v4968_v4 = vld [vmem:[%s6270_s1 + $0xc8] sm:$0xff] }
  0x62   : > { %1904 = vmatpush.bf16.msra.mxu2 %v4961_v39  ;;  %v4984_v8 = vld [vmem:[%s6270_s1 + $0x348] sm:$0xff] }
  0x63   : > { %1998 = vmatpush.bf16.msra.mxu3 %v4977_v55  ;;  %v5019_v55 = vld [vmem:[%s6270_s1 + $0x1e0] sm:$0xff] }
  0x64   : > { %1006 = vmatmul.bf16.gmra.mxu3 %v5584_v18 }
  0x65   : > { %1259 = vmatpush.bf16.msra.mxu1 %v4916_v7  ;;  %1661 = vmatpush.bf16.msra.mxu0 %v4952_v11  ;;  %v4967_v7 = vld [vmem:[%s6270_s1 + $0xc0] sm:$0xff] }
  0x66   : > { %1905 = vmatpush.bf16.msra.mxu2 %v4960_v49  ;;  %v4983_v11 = vld [vmem:[%s6270_s1 + $0x340] sm:$0xff]  ;;  %v4996_v49 = vld [vmem:[%s6270_s1 + $0x568] sm:$0xff] }
  0x67   : > { %1999 = vmatpush.bf16.msra.mxu3 %v4976_v60  ;;  %v5001_v60 = vld [vmem:[%s6270_s1 + $0x5d0] sm:$0xff] }
  0x69   : > { %1260 = vmatpush.bf16.msra.mxu1 %v4915_v10  ;;  %1662 = vmatpush.bf16.msra.mxu0 %v4951_v15  ;;  %v5716_v10 = vld [vmem:[#allocation2 + $0x40] sm:$0xff] }
  0x6a   : > { %1906 = vmatpush.bf16.msra.mxu2 %v4959_v54 }
  0x6b   : > { %2000 = vmatpush.bf16.msra.mxu3 %v4975_v3  ;;  %v5018_v3 = vld [vmem:[%s6270_s1 + $0x1d8] sm:$0xff] }
  0x6c   : > { %739 = vmatmul.bf16.gmra.mxu1 %v5587_v19  ;;  %1136 = vmatmul.bf16.gmra.mxu0 %v5589_v20 }
  0x6d   : > { %1822 = vmatpush.bf16.msrb.mxu1 %v4974_v22  ;;  %2095 = vmatpush.bf16.msrb.mxu0 %v4990_v26  ;;  %v4998_v22 = vld [vmem:[%s6270_s1 + $0x578] sm:$0xff] }
  0x6f   : > { %1395 = vmatmul.bf16.vlgmr.msrb.gmra.mxu2 %v5591_v21 }
  0x70   : > { %2299 = vmatpush.bf16.msrb.mxu2 %v5006_v1  ;;  %v5012_v1 = vld [vmem:[%s6270_s1 + $0x168] sm:$0xff] }
  0x71   : > { %1823 = vmatpush.bf16.msrb.mxu1 %v4973_v25  ;;  %2096 = vmatpush.bf16.msrb.mxu0 %v4989_v36  ;;  %v4997_v36 = vld [vmem:[%s6270_s1 + $0x570] sm:$0xff] }
  0x74   : > { %1529 = vmatmul.bf16.vlgmr.msrb.gmra.mxu3 %v5617_v31  ;;  %2300 = vmatpush.bf16.msrb.mxu2 %v5005_v38  ;;  %v5000_v38 = vld [vmem:[%s6270_s1 + $0x5c8] sm:$0xff] }
  0x75   : > { %1824 = vmatpush.bf16.msrb.mxu1 %v4972_v35  ;;  %2097 = vmatpush.bf16.msrb.mxu0 %v4988_v41  ;;  %v5003_v35 = vld [vmem:[%s6270_s1 + $0x5e0] sm:$0xff] }
  0x76   : > { %2466 = vmatpush.bf16.msrb.mxu3 %v5022_v9 }
  0x78   : > { %2301 = vmatpush.bf16.msrb.mxu2 %v5004_v17 }
  0x79   : > { %1825 = vmatpush.bf16.msrb.mxu1 %v4971_v40  ;;  %2098 = vmatpush.bf16.msrb.mxu0 %v4987_v53 }
  0x7a   : > { %2467 = vmatpush.bf16.msrb.mxu3 %v5021_v23  ;;  %v5017_v23 = vld [vmem:[%s6270_s1 + $0x1d0] sm:$0xff] }
  0x7c   : > { %744 = vmatmul.bf16.gmra.mxu1 %v5620_v32  ;;  %1141 = vmatmul.bf16.gmra.mxu0 %v5622_v33 }
  0x7d   : > { %1826 = vmatpush.bf16.msrb.mxu1 %v4970_v51  ;;  %2099 = vmatpush.bf16.msrb.mxu0 %v4986_v59  ;;  %v5013_v51 = vld [vmem:[%s6270_s1 + $0x170] sm:$0xff] }
  0x7e   : > { %2302 = vmatpush.bf16.msrb.mxu2 %v5003_v35 }
  0x7f   : > { %1400 = vmatmul.bf16.gmra.mxu2 %v5624_v34 }
  0x81   : > { %1827 = vmatpush.bf16.msrb.mxu1 %v4969_v58  ;;  %2100 = vmatpush.bf16.msrb.mxu0 %v4985_v6 }
  0x84   : > { %1534 = vmatmul.bf16.gmra.mxu3 %v5650_v44 }
  0x85   : > { %1828 = vmatpush.bf16.msrb.mxu1 %v4968_v4  ;;  %2101 = vmatpush.bf16.msrb.mxu0 %v4984_v8 }
  0x89   : > { %1829 = vmatpush.bf16.msrb.mxu1 %v4967_v7  ;;  %2102 = vmatpush.bf16.msrb.mxu0 %v4983_v11  ;;  %v4999_v11 = vld [vmem:[%s6270_s1 + $0x5c0] sm:$0xff] }
  0x8c   : > { %1261 = vmatmul.bf16.vlgmr.msra.gmra.mxu1 %v5653_v45  ;;  %1663 = vmatmul.bf16.vlgmr.msra.gmra.mxu0 %v4947_v46  ;;  %v5002_v46 = vld [vmem:[%s6270_s1 + $0x5d8] sm:$0xff] }
  0x8d   : > { %2197 = vmatpush.bf16.msra.mxu1 %v4998_v22  ;;  %2542 = vmatpush.bf16.msra.mxu0 %v5014_v37  ;;  %v5011_v22 = vld [vmem:[%s6270_s1 + $0x160] sm:$0xff] }
  0x8e   : > { %2303 = vmatpush.bf16.msrb.mxu2 %v5002_v46  ;;  %v5016_v46 = vld [vmem:[%s6270_s1 + $0x1c8] sm:$0xff] }
  0x8f   : > { %1405 = vmatmul.bf16.gmra.mxu2 %v5658_v50 }
  0x91   : > { %2198 = vmatpush.bf16.msra.mxu1 %v4997_v36  ;;  %2543 = vmatpush.bf16.msra.mxu0 %v5013_v51  ;;  %v4993_v51 = vld [vmem:[%s6270_s1 + $0x550] sm:$0xff] }
  0x92   : > { %2304 = vmatpush.bf16.msrb.mxu2 %v5001_v60 }
  0x94   : > { %1539 = vmatmul.bf16.gmra.mxu3 %v5683_v62 }
  0x95   : > { %2199 = vmatpush.bf16.msra.mxu1 %v4996_v49  ;;  %2544 = vmatpush.bf16.msra.mxu0 %v5012_v1 }
  0x96   : > { %2305 = vmatpush.bf16.msrb.mxu2 %v5000_v38 }
  0x99   : > { %2545 = vmatpush.bf16.msra.mxu0 %v5011_v22 }
  0x9a   : > { %2306 = vmatpush.bf16.msrb.mxu2 %v4999_v11 }
  0x9c   : > { %1266 = vmatmul.bf16.gmra.mxu1 %v5686_v63  ;;  %1668 = vmatmul.bf16.gmra.mxu0 %v4948_v0  ;;  %v4995_v0 = vld [vmem:[%s6270_s1 + $0x560] sm:$0xff] }
  0x9d   : > { %2200 = vmatpush.bf16.msra.mxu1 %v4995_v0  ;;  %v5015_v0 = vld [vmem:[%s6270_s1 + $0x1c0] sm:$0xff] }
  0x9f   : > { %1410 = vmatmul.bf16.gmra.mxu2 %v5691_v2 }
  0xa4   : > { %1544 = vmatmul.bf16.gmra.mxu3 %v5716_v10 }
  0xa9   : > { %v629_v14 = vpop.f32.mrf.mxu0  ;;  %v5724_v15 = vpop.f32.mrf.mxu1 }
  0xac   : > { %1271 = vmatmul.bf16.gmra.mxu1 %v5722_v12  ;;  %1673 = vmatmul.bf16.gmra.mxu0 %v4949_v13 }
  0xaf   : > { %1907 = vmatmul.bf16.vlgmr.msra.gmra.mxu2 %v5494_v29 }
  0xb1   : > { %v5737_v24 = vpop.f32.mrf.mxu0  ;;  %v5739_v25 = vpop.f32.mrf.mxu1 }
  0xb2   : > { %v857_v26 = vpop.f32.mrf.mxu2 }
  0xb4   : > { %2001 = vmatmul.bf16.vlgmr.msra.gmra.mxu3 %v5413_v42  ;;  %v5020_v42 = vld [vmem:[%s6270_s1 + $0x1e8] sm:$0xff] }
  0xb5   : > { %2468 = vmatpush.bf16.msrb.mxu3 %v5020_v42 }
  0xb7   : > { %v992_v43 = vpop.f32.mrf.mxu3 }
  0xb9   : > { %v5753_v39 = vpop.f32.mrf.mxu0  ;;  %v5755_v40 = vpop.f32.mrf.mxu1  ;;  %2469 = vmatpush.bf16.msrb.mxu3 %v5019_v55 }
  0xba   : > { %v859_v41 = vpop.f32.mrf.mxu2 }
  0xbc   : > { %1276 = vmatmul.bf16.gmra.mxu1 %v5741_v27  ;;  %1678 = vmatmul.bf16.gmra.mxu0 %v4950_v28 }
  0xbd   : > { %2470 = vmatpush.bf16.msrb.mxu3 %v5018_v3 }
  0xbf   : > { %1912 = vmatmul.bf16.gmra.mxu2 %v5549_v56  ;;  %v994_v59 = vpop.f32.mrf.mxu3 }
  0xc1   : > { %v5771_v53 = vpop.f32.mrf.mxu0  ;;  %v5773_v54 = vpop.f32.mrf.mxu1  ;;  %2471 = vmatpush.bf16.msrb.mxu3 %v5017_v23  ;;  %v4991_v23 = vld [vmem:[%s6270_s1 + $0x540] sm:$0xff] }
  0xc2   : > { %v862_v58 = vpop.f32.mrf.mxu2 }
  0xc4   : > { %2006 = vmatmul.bf16.gmra.mxu3 %v5477_v16 }
  0xc5   : > { %2472 = vmatpush.bf16.msrb.mxu3 %v5016_v46 }
  0xc7   : > { %v997_v8 = vpop.f32.mrf.mxu3 }
  0xc9   : > { %v730_v4 = vpop.f32.mrf.mxu1  ;;  %v1127_v6 = vpop.f32.mrf.mxu0  ;;  %2473 = vmatpush.bf16.msrb.mxu3 %v5015_v0 }
  0xca   : > { %v731_v16 = vadd.f32 %v730_v4, %v629_v14  ;;  %v864_v7 = vpop.f32.mrf.mxu2  ;;  %v4994_v14 = vld [vmem:[%s6270_s1 + $0x558] sm:$0xff] }
  0xcb   : > { %2201 = vmatpush.bf16.msra.mxu1 %v4994_v14 }
  0xcc   : > { %v877_v9 = vadd.f32 %v857_v26, %v731_v16  ;;  %1830 = vmatmul.bf16.vlgmr.msrb.gmra.mxu1 %v5332_v47  ;;  %2103 = vmatmul.bf16.vlgmr.msrb.gmra.mxu0 %v5496_v30 }
  0xce   : > { %v1012_v13 = vadd.f32 %v992_v43, %v877_v9 }
  0xcf   : > { %1917 = vmatmul.bf16.gmra.mxu2 %v5587_v19  ;;  %v999_v37 = vpop.f32.mrf.mxu3  ;;  %2202 = vmatpush.bf16.msra.mxu1 %v4993_v51 }
  0xd0   : > { %v5800_v17 = vadd.f32 %v1127_v6, %v1012_v13  ;;  %v5038_v6 = vld [vmem:[%s6270_s1 + $0x3f8] sm:$0xff]  ;;  %v5008_v13 = vld [vmem:[%s6270_s1 + $0x148] sm:$0xff] }
  0xd1   : > { %v732_v26 = vpop.f32.mrf.mxu1  ;;  %v1129_v28 = vpop.f32.mrf.mxu0  ;;  %2735 = vmatpush.bf16.msra.mxu2 %v5038_v6 }
  0xd2   : > { %v733_v35 = vadd.f32 %v732_v26, %v5737_v24  ;;  %v867_v36 = vpop.f32.mrf.mxu2  ;;  %v5010_v24 = vld [vmem:[%s6270_s1 + $0x158] sm:$0xff] }
  0xd3   : > { %2546 = vmatpush.bf16.msra.mxu0 %v5010_v24 }
  0xd4   : > { %v878_v42 = vadd.f32 %v859_v41, %v733_v35  ;;  %2011 = vmatmul.bf16.gmra.mxu3 %v5533_v61 }
  0xd6   : > { %v1013_v43 = vadd.f32 %v994_v59, %v878_v42 }
  0xd7   : > { %v1002_v59 = vpop.f32.mrf.mxu3 }
  0xd8   : > { %v5816_v49 = vadd.f32 %v1129_v28, %v1013_v43  ;;  %v5037_v28 = vld [vmem:[%s6270_s1 + $0x3f0] sm:$0xff] }
  0xd9   : > { %v735_v55 = vpop.f32.mrf.mxu1  ;;  %v1132_v60 = vpop.f32.mrf.mxu0  ;;  %2736 = vmatpush.bf16.msra.mxu2 %v5037_v28 }
  0xda   : > { %v736_v41 = vadd.f32 %v735_v55, %v5753_v39  ;;  %v869_v61 = vpop.f32.mrf.mxu2  ;;  %v5009_v39 = vld [vmem:[%s6270_s1 + $0x150] sm:$0xff] }
  0xdb   : > { %2547 = vmatpush.bf16.msra.mxu0 %v5009_v39 }
  0xdc   : > { %v879_v1 = vadd.f32 %v862_v58, %v736_v41  ;;  %1835 = vmatmul.bf16.gmra.mxu1 %v5423_v52  ;;  %2108 = vmatmul.bf16.gmra.mxu0 %v5551_v5  ;;  %v4992_v58 = vld [vmem:[%s6270_s1 + $0x548] sm:$0xff] }
  0xdd   : > { %2203 = vmatpush.bf16.msra.mxu1 %v4992_v58 }
  0xde   : > { %v1014_v3 = vadd.f32 %v997_v8, %v879_v1 }
  0xdf   : > { %1922 = vmatmul.bf16.gmra.mxu2 %v5620_v32  ;;  %v1004_v11 = vpop.f32.mrf.mxu3  ;;  %2548 = vmatpush.bf16.msra.mxu0 %v5008_v13 }
  0xe0   : > { %v5834_v4 = vadd.f32 %v1132_v60, %v1014_v3 }
  0xe1   : > { %v737_v38 = vpop.f32.mrf.mxu1  ;;  %v1134_v16 = vpop.f32.mrf.mxu0  ;;  %2204 = vmatpush.bf16.msra.mxu1 %v4991_v23 }
  0xe2   : > { %v738_v8 = vadd.f32 %v737_v38, %v5771_v53  ;;  %v872_v9 = vpop.f32.mrf.mxu2  ;;  %v5007_v53 = vld [vmem:[%s6270_s1 + $0x140] sm:$0xff] }
  0xe3   : > { %2549 = vmatpush.bf16.msra.mxu0 %v5007_v53  ;;  %v5033_v53 = vld [vmem:[%s6270_s1 + $0x3d0] sm:$0xff] }
  0xe4   : > { %v880_v14 = vadd.f32 %v864_v7, %v738_v8  ;;  %2016 = vmatmul.bf16.gmra.mxu3 %v5584_v18  ;;  %v5046_v7 = vld [vmem:[%s6270_s1 + $0x478] sm:$0xff]  ;;  %v5029_v8 = vld [vmem:[%s6270_s1 + $0x270] sm:$0xff] }
  0xe5   : > { %2835 = vmatpush.bf16.msra.mxu3 %v5046_v7  ;;  %v5028_v7 = vld [vmem:[%s6270_s1 + $0x268] sm:$0xff] }
  0xe6   : > { %v1015_v22 = vadd.f32 %v999_v37, %v880_v14 }
  0xe7   : > { %v1007_v43 = vpop.f32.mrf.mxu3 }
  0xe8   : > { %v5853_v26 = vadd.f32 %v1134_v16, %v1015_v22 }
  0xe9   : > { %v740_v35 = vpop.f32.mrf.mxu1  ;;  %v1137_v18 = vpop.f32.mrf.mxu0 }
  0xea   : > { %v741_v37 = vadd.f32 %v740_v35, %v5724_v15  ;;  %v874_v42 = vpop.f32.mrf.mxu2  ;;  %v5043_v35 = vld [vmem:[%s6270_s1 + $0x460] sm:$0xff] }
  0xec   : > { %v881_v46 = vadd.f32 %v867_v36, %v741_v37  ;;  %1840 = vmatmul.bf16.gmra.mxu1 %v5334_v48  ;;  %2113 = vmatmul.bf16.gmra.mxu0 %v5589_v20  ;;  %v5036_v36 = vld [vmem:[%s6270_s1 + $0x3e8] sm:$0xff]  ;;  %v5030_v48 = vld [vmem:[%s6270_s1 + $0x278] sm:$0xff] }
  0xed   : > { %2737 = vmatpush.bf16.msra.mxu2 %v5036_v36  ;;  %2635 = vmatpush.bf16.msrb.mxu1 %v5030_v48 }
  0xee   : > { %v1016_v51 = vadd.f32 %v1002_v59, %v881_v46 }
  0xef   : > { %2307 = vmatmul.bf16.vlgmr.msrb.gmra.mxu2 %v5617_v31  ;;  %v1009_v15 = vpop.f32.mrf.mxu3  ;;  %v5045_v31 = vld [vmem:[%s6270_s1 + $0x470] sm:$0xff] }
  0xf0   : > { %v5865_v24 = vadd.f32 %v1137_v18, %v1016_v51  ;;  %2836 = vmatpush.bf16.msra.mxu3 %v5045_v31  ;;  %v5041_v31 = vld [vmem:[%s6270_s1 + $0x450] sm:$0xff] }
  0xf1   : > { %v742_v55 = vpop.f32.mrf.mxu1  ;;  %v1139_v60 = vpop.f32.mrf.mxu0  ;;  %2636 = vmatpush.bf16.msrb.mxu1 %v5029_v8 }
  0xf2   : > { %v743_v41 = vadd.f32 %v742_v55, %v5739_v25  ;;  %v1396_v0 = vpop.f32.mrf.mxu2 }
  0xf4   : > { %v882_v1 = vadd.f32 %v869_v61, %v743_v41  ;;  %2474 = vmatmul.bf16.vlgmr.msrb.gmra.mxu3 %v5332_v47  ;;  %v5035_v47 = vld [vmem:[%s6270_s1 + $0x3e0] sm:$0xff] }
  0xf5   : > { %2738 = vmatpush.bf16.msra.mxu2 %v5035_v47  ;;  %2637 = vmatpush.bf16.msrb.mxu1 %v5028_v7  ;;  %v5031_v41 = vld [vmem:[%s6270_s1 + $0x3c0] sm:$0xff] }
  0xf6   : > { %v1017_v3 = vadd.f32 %v1004_v11, %v882_v1 }
  0xf7   : > { %v1530_v58 = vpop.f32.mrf.mxu3 }
  0xf8   : > { %v5878_v59 = vadd.f32 %v1139_v60, %v1017_v3 }
  0xf9   : > { %v745_v25 = vpop.f32.mrf.mxu1  ;;  %v1142_v61 = vpop.f32.mrf.mxu0 }
  0xfa   : > { %v746_v39 = vadd.f32 %v745_v25, %v5755_v40  ;;  %v5881_v6 = vpop.f32.mrf.mxu2  ;;  %v5054_v40 = vld [vmem:[%s6270_s1 + $0x4f8] sm:$0xff] }
  0xfb   : > { %2935 = vmatpush.bf16.msrb.mxu0 %v5054_v40 }
  0xfc   : > { %v883_v38 = vadd.f32 %v872_v9, %v746_v39  ;;  %1845 = vmatmul.bf16.gmra.mxu1 %v5429_v57  ;;  %2118 = vmatmul.bf16.gmra.mxu0 %v5622_v33  ;;  %v5044_v57 = vld [vmem:[%s6270_s1 + $0x468] sm:$0xff] }
  0xfd   : > { %2837 = vmatpush.bf16.msra.mxu3 %v5044_v57 }
  0xfe   : > { %v1018_v16 = vadd.f32 %v1007_v43, %v883_v38  ;;  %v5051_v38 = vld [vmem:[%s6270_s1 + $0x4e0] sm:$0xff] }
  0xff   : > { %2312 = vmatmul.bf16.gmra.mxu2 %v5650_v44  ;;  %v5034_v44 = vld [vmem:[%s6270_s1 + $0x3d8] sm:$0xff]  ;;  %v1532_v22 = vpop.f32.mrf.mxu3 }
 0x100   : > { %v5898_v33 = vadd.f32 %v1142_v61, %v1018_v16  ;;  %2739 = vmatpush.bf16.msra.mxu2 %v5034_v44 }
 0x101   : > { %v747_v9 = vpop.f32.mrf.mxu1  ;;  %v1144_v11 = vpop.f32.mrf.mxu0  ;;  %2838 = vmatpush.bf16.msra.mxu3 %v5043_v35  ;;  %v5025_v35 = vld [vmem:[%s6270_s1 + $0x250] sm:$0xff] }
 0x102   : > { %v748_v13 = vadd.f32 %v747_v9, %v5773_v54  ;;  %v5904_v14 = vpop.f32.mrf.mxu2  ;;  %v5053_v54 = vld [vmem:[%s6270_s1 + $0x4f0] sm:$0xff] }
 0x103   : > { %2936 = vmatpush.bf16.msrb.mxu0 %v5053_v54 }
 0x104   : > { %v884_v23 = vadd.f32 %v874_v42, %v748_v13  ;;  %2479 = vmatmul.bf16.gmra.mxu3 %v5423_v52  ;;  %2740 = vmatpush.bf16.msra.mxu2 %v5033_v53  ;;  %v5032_v52 = vld [vmem:[%s6270_s1 + $0x3c8] sm:$0xff]  ;;  %v5039_v13 = vld [vmem:[%s6270_s1 + $0x440] sm:$0xff] }
 0x106   : > { %v1019_v28 = vadd.f32 %v1009_v15, %v884_v23 }
 0x107   : > { %v1535_v51 = vpop.f32.mrf.mxu3 }
 0x108   : > { %v5919_v18 = vadd.f32 %v1144_v11, %v1019_v28  ;;  %2741 = vmatpush.bf16.msra.mxu2 %v5032_v52 }
 0x109   : > { %v1262_v37 = vpop.f32.mrf.mxu1  ;;  %v1664_v42 = vpop.f32.mrf.mxu0 }
 0x10a   : > { %v1282_v43 = vadd.f32 %v1262_v37, %v5800_v17  ;;  %v5925_v46 = vpop.f32.mrf.mxu2  ;;  %v5027_v17 = vld [vmem:[%s6270_s1 + $0x260] sm:$0xff] }
 0x10b   : > { %2638 = vmatpush.bf16.msrb.mxu1 %v5027_v17 }
 0x10c   : > { %v1416_v55 = vadd.f32 %v1396_v0, %v1282_v43  ;;  %2205 = vmatmul.bf16.vlgmr.msra.gmra.mxu1 %v5591_v21  ;;  %2550 = vmatmul.bf16.vlgmr.msra.gmra.mxu0 %v5494_v29  ;;  %v5052_v0 = vld [vmem:[%s6270_s1 + $0x4e8] sm:$0xff]  ;;  %v5042_v29 = vld [vmem:[%s6270_s1 + $0x458] sm:$0xff] }
 0x10d   : > { %2937 = vmatpush.bf16.msrb.mxu0 %v5052_v0  ;;  %2839 = vmatpush.bf16.msra.mxu3 %v5042_v29  ;;  %v5998_v29 = vld [vmem:[#allocation2 + $0x48] sm:$0xff] }
 0x10e   : > { %v1550_v60 = vadd.f32 %v1530_v58, %v1416_v55  ;;  %2742 = vmatpush.bf16.msra.mxu2 %v5031_v41  ;;  %v5955_v58 = vld [vmem:[#allocation2 + $0x40] sm:$0xff]  ;;  %v5048_v41 = vld [vmem:[%s6270_s1 + $0x4c8] sm:$0xff] }
 0x10f   : > { %2317 = vmatmul.bf16.gmra.mxu2 %v5683_v62  ;;  %v5945_v62 = vld [vmem:[%s6271_s2] ss:$0 sm:$0xff]  ;;  %v1537_v48 = vpop.f32.mrf.mxu3 }
 0x110   : > { %v1684_v21 = vadd.f32 %v1664_v42, %v1550_v60 }
 0x111   : > { %v1264_v15 = vpop.f32.mrf.mxu1  ;;  %v1666_v1 = vpop.f32.mrf.mxu0  ;;  %2840 = vmatpush.bf16.msra.mxu3 %v5041_v31  ;;  %2938 = vmatpush.bf16.msrb.mxu0 %v5051_v38 }
 0x112   : > { %v1283_v3 = vadd.f32 %v1264_v15, %v5816_v49  ;;  %v5948_v36 = vpop.f32.mrf.mxu2  ;;  %v1695_v61 = vadd.f32 %v5945_v62, %v1684_v21  ;;  %v5026_v49 = vld [vmem:[%s6270_s1 + $0x258] sm:$0xff] }
 0x113   : > { %2639 = vmatpush.bf16.msrb.mxu1 %v5026_v49  ;;  %v5062_v21 = vld [vmem:[%s6270_s1 + $0x1b8] sm:$0xff] }
 0x114   : > { %v1417_v25 = vadd.f32 %v5881_v6, %v1283_v3  ;;  %2484 = vmatmul.bf16.gmra.mxu3 %v5955_v58  ;;  %v5040_v6 = vld [vmem:[%s6270_s1 + $0x448] sm:$0xff]  ;;  %v1711_v40 = vmul.f32 -0.419, %v1695_v61  ;;  %vm1703_vm6 = vcmp.gt.f32.partialorder %v1695_v61, 0.0  ;;  %3169 = vmatpush.bf16.msrb.mxu2 %v5062_v21 }
 0x115   : > { %2841 = vmatpush.bf16.msra.mxu3 %v5040_v6  ;;  %v5076_v21 = vld [vmem:[%s6270_s1 + $0x428] sm:$0xff] }
 0x116   : > { %v1551_v39 = vadd.f32 %v1532_v22, %v1417_v25  ;;  %v1719_v53 = vsel %vm1703_vm6, %v1695_v61, %v1711_v40  ;;  %vm2375_vm6 = vcmask 1046528  }
 0x117   : > { %v1540_v44 = vpop.f32.mrf.mxu3  ;;  %2640 = vmatpush.bf16.msrb.mxu1 %v5025_v35 }
 0x118   : > { %v1685_v47 = vadd.f32 %v1666_v1, %v1551_v39 }
 0x119   : > { %v1267_v16 = vpop.f32.mrf.mxu1  ;;  %v1669_v8 = vpop.f32.mrf.mxu0  ;;  %2842 = vmatpush.bf16.msra.mxu3 %v5039_v13 }
 0x11a   : > { %v1696_v57 = vadd.f32 %v5945_v62, %v1685_v47  ;;  %v1284_v9 = vadd.f32 %v1267_v16, %v5834_v4  ;;  %v5969_v11 = vpop.f32.mrf.mxu2  ;;  %v5050_v4 = vld [vmem:[%s6270_s1 + $0x4d8] sm:$0xff] }
 0x11b   : > { %2939 = vmatpush.bf16.msrb.mxu0 %v5050_v4 }
 0x11c   : > { %vm1704_vm7 = vcmp.gt.f32.partialorder %v1696_v57, 0.0  ;;  %v1712_v22 = vmul.f32 -0.419, %v1696_v57  ;;  %v1418_v23 = vadd.f32 %v5904_v14, %v1284_v9  ;;  %2210 = vmatmul.bf16.gmra.mxu1 %v5624_v34  ;;  %2555 = vmatmul.bf16.gmra.mxu0 %v5549_v56  ;;  %v5049_v56 = vld [vmem:[%s6270_s1 + $0x4d0] sm:$0xff] }
 0x11e   : > { %v1720_v28 = vsel %vm1704_vm7, %v1696_v57, %v1712_v22  ;;  %v1552_v7 = vadd.f32 %v1535_v51, %v1418_v23  ;;  %v5024_v51 = vld [vmem:[%s6270_s1 + $0x248] sm:$0xff] }
 0x11f   : > { %v1727_v54 = vadd.f32 %v1720_v28, %v1719_v53  ;;  %2322 = vmatmul.bf16.gmra.mxu2 %v5716_v10  ;;  %v1542_v10 = vpop.f32.mrf.mxu3  ;;  %2940 = vmatpush.bf16.msrb.mxu0 %v5049_v56 }
 0x120   : > { %v1686_v14 = vadd.f32 %v1669_v8, %v1552_v7  ;;  %2641 = vmatpush.bf16.msrb.mxu1 %v5024_v51  ;;  %v6017_v8 = vld [vmem:[#allocation2 + $0x54] sm:$0xff] }
 0x121   : > { %v1269_v34 = vpop.f32.mrf.mxu1  ;;  %v1671_v37 = vpop.f32.mrf.mxu0  ;;  %v6067_v51 = vld [vmem:[%s6270_s1 + $0x4b0] sm:$0xff] }
 0x122   : > { %v1697_v42 = vadd.f32 %v5945_v62, %v1686_v14  ;;  %v1285_v52 = vadd.f32 %v1269_v34, %v5853_v26  ;;  %v5989_v43 = vpop.f32.mrf.mxu2 }
 0x123   : > { %2941 = vmatpush.bf16.msrb.mxu0 %v5048_v41 }
 0x124   : > { %vm1705_vm8 = vcmp.gt.f32.partialorder %v1697_v42, 0.0  ;;  %v1713_v55 = vmul.f32 -0.419, %v1697_v42  ;;  %v1419_v60 = vadd.f32 %v5925_v46, %v1285_v52  ;;  %2489 = vmatmul.bf16.gmra.mxu3 %v5998_v29  ;;  %v5023_v46 = vld [vmem:[%s6270_s1 + $0x240] sm:$0xff]  ;;  %v6055_v52 = vld [vmem:[%s6270_s1 + $0x4b8] sm:$0xff] }
 0x125   : > { %2642 = vmatpush.bf16.msrb.mxu1 %v5023_v46  ;;  %v5068_v46 = vld [vmem:[%s6270_s1 + $0x228] sm:$0xff] }
 0x126   : > { %v1721_v17 = vsel %vm1705_vm8, %v1697_v42, %v1713_v55  ;;  %v1553_v0 = vadd.f32 %v1537_v48, %v1419_v60  ;;  %v5047_v48 = vld [vmem:[%s6270_s1 + $0x4c0] sm:$0xff] }
 0x127   : > { %v1728_v26 = vadd.f32 %v1727_v54, %v1721_v17  ;;  %v1545_v39 = vpop.f32.mrf.mxu3  ;;  %2942 = vmatpush.bf16.msrb.mxu0 %v5047_v48  ;;  %v5060_v54 = vld [vmem:[%s6270_s1 + $0x1a8] sm:$0xff]  ;;  %v6069_v60 = vld [vmem:[#allocation2 + $0x5c] sm:$0xff] }
 0x128   : > { %v1687_v15 = vadd.f32 %v1671_v37, %v1553_v0  ;;  %v5070_v37 = vld [vmem:[%s6270_s1 + $0x238] sm:$0xff] }
 0x129   : > { %v1272_v1 = vpop.f32.mrf.mxu1  ;;  %v1674_v3 = vpop.f32.mrf.mxu0  ;;  %3093 = vmatpush.bf16.msra.mxu1 %v5070_v37  ;;  %v5058_v17 = vld [vmem:[%s6270_s1 + $0x198] sm:$0xff] }
 0x12a   : > { %v1698_v31 = vadd.f32 %v5945_v62, %v1687_v15  ;;  %v1286_v25 = vadd.f32 %v1272_v1, %v5865_v24  ;;  %v6012_v61 = vpop.f32.mrf.mxu2 }
 0x12b   : > { %3362 = vmatpush.bf16.msra.mxu0 %v6055_v52 }
 0x12c   : > { %vm1706_vm9 = vcmp.gt.f32.partialorder %v1698_v31, 0.0  ;;  %v1714_v49 = vmul.f32 -0.419, %v1698_v31  ;;  %v1420_v38 = vadd.f32 %v5948_v36, %v1286_v25  ;;  %2215 = vmatmul.bf16.gmra.mxu1 %v5658_v50  ;;  %2560 = vmatmul.bf16.gmra.mxu0 %v5587_v19 }
 0x12e   : > { %v1722_v6 = vsel %vm1706_vm9, %v1698_v31, %v1714_v49  ;;  %v1554_v47 = vadd.f32 %v1540_v44, %v1420_v38  ;;  %v5061_v44 = vld [vmem:[%s6270_s1 + $0x1b0] sm:$0xff] }
 0x12f   : > { %v1729_v16 = vadd.f32 %v1728_v26, %v1722_v6  ;;  %2743 = vmatmul.bf16.vlgmr.msra.gmra.mxu2 %v6017_v8  ;;  %v6024_v36 = vpop.f32.mrf.mxu3  ;;  %3363 = vmatpush.bf16.msra.mxu0 %v6067_v51  ;;  %v5067_v6 = vld [vmem:[%s6270_s1 + $0x220] sm:$0xff] }
 0x130   : > { %v1688_v24 = vadd.f32 %v1674_v3, %v1554_v47  ;;  %3170 = vmatpush.bf16.msrb.mxu2 %v5061_v44 }
 0x131   : > { %v1274_v40 = vpop.f32.mrf.mxu1  ;;  %v1676_v57 = vpop.f32.mrf.mxu0 }
 0x132   : > { %v1699_v9 = vadd.f32 %v5945_v62, %v1688_v24  ;;  %v1287_v13 = vadd.f32 %v1274_v40, %v5878_v59  ;;  %v6022_v22 = vpop.f32.mrf.mxu2 }
 0x134   : > { %vm1707_vm10 = vcmp.gt.f32.partialorder %v1699_v9, 0.0  ;;  %v1715_v19 = vmul.f32 -0.419, %v1699_v9  ;;  %v1421_v50 = vadd.f32 %v5969_v11, %v1287_v13  ;;  %2843 = vmatmul.bf16.vlgmr.msra.gmra.mxu3 %v5496_v30  ;;  %v5078_v30 = vld [vmem:[%s6270_s1 + $0x438] sm:$0xff]  ;;  %3171 = vmatpush.bf16.msrb.mxu2 %v5060_v54  ;;  %v6127_v54 = vld [vmem:[#allocation2 + $0x64] sm:$0xff] }
 0x135   : > { %3262 = vmatpush.bf16.msrb.mxu3 %v5078_v30 }
 0x136   : > { %v1723_v23 = vsel %vm1707_vm10, %v1699_v9, %v1715_v19  ;;  %v1555_v4 = vadd.f32 %v1542_v10, %v1421_v50  ;;  %v5077_v10 = vld [vmem:[%s6270_s1 + $0x430] sm:$0xff]  ;;  %v5056_v9 = vld [vmem:[%s6270_s1 + $0x188] sm:$0xff] }
 0x137   : > { %v1730_v53 = vadd.f32 %v1729_v16, %v1723_v23  ;;  %v6038_v34 = vpop.f32.mrf.mxu3  ;;  %v5134_v23 = vld [vmem:[#allocation2 + $0x8] sm:$0xff] }
 0x138   : > { %v1689_v28 = vadd.f32 %v1676_v57, %v1555_v4  ;;  %v5074_v57 = vld [vmem:[%s6270_s1 + $0x418] sm:$0xff]  ;;  %v5055_v4 = vld [vmem:[%s6270_s1 + $0x180] sm:$0xff] }
 0x139   : > { %v1277_v59 = vpop.f32.mrf.mxu1  ;;  %v1679_v7 = vpop.f32.mrf.mxu0  ;;  %3263 = vmatpush.bf16.msrb.mxu3 %v5077_v10  ;;  %v5082_v10 = vld [vmem:[%s6270_s1 + $0x498] sm:$0xff] }
 0x13a   : > { %v1700_v35 = vadd.f32 %v5945_v62, %v1689_v28  ;;  %v1288_v11 = vadd.f32 %v1277_v59, %v5898_v33  ;;  %v6036_v14 = vpop.f32.mrf.mxu2  ;;  %v5059_v33 = vld [vmem:[%s6270_s1 + $0x1a0] sm:$0xff] }
 0x13b   : > { %3172 = vmatpush.bf16.msrb.mxu2 %v5059_v33  ;;  %v5083_v59 = vld [vmem:[%s6270_s1 + $0x4a0] sm:$0xff]  ;;  %v5065_v33 = vld [vmem:[%s6270_s1 + $0x210] sm:$0xff] }
 0x13c   : > { %vm1708_vm11 = vcmp.gt.f32.partialorder %v1700_v35, 0.0  ;;  %v1716_v56 = vmul.f32 -0.419, %v1700_v35  ;;  %v1422_v42 = vadd.f32 %v5989_v43, %v1288_v11  ;;  %2220 = vmatmul.bf16.gmra.mxu1 %v5691_v2  ;;  %2565 = vmatmul.bf16.gmra.mxu0 %v5620_v32  ;;  %v5069_v2 = vld [vmem:[%s6270_s1 + $0x230] sm:$0xff] }
 0x13d   : > { %3094 = vmatpush.bf16.msra.mxu1 %v5069_v2  ;;  %3264 = vmatpush.bf16.msrb.mxu3 %v5076_v21  ;;  %v5072_v2 = vld [vmem:[%s6270_s1 + $0x408] sm:$0xff] }
 0x13e   : > { %v1724_v32 = vsel %vm1708_vm11, %v1700_v35, %v1716_v56  ;;  %v1556_v43 = vadd.f32 %v1545_v39, %v1422_v42  ;;  %v5075_v39 = vld [vmem:[%s6270_s1 + $0x420] sm:$0xff]  ;;  %v6158_v21 = vld [vmem:[#allocation2 + $0x6c] sm:$0xff] }
 0x13f   : > { %v1731_v55 = vadd.f32 %v1730_v53, %v1724_v32  ;;  %2748 = vmatmul.bf16.gmra.mxu2 %v6069_v60  ;;  %v2004_v48 = vpop.f32.mrf.mxu3 }
 0x140   : > { %v1690_v41 = vadd.f32 %v1679_v7, %v1556_v43  ;;  %3173 = vmatpush.bf16.msrb.mxu2 %v5058_v17 }
 0x141   : > { %v1279_v0 = vpop.f32.mrf.mxu1  ;;  %v1681_v26 = vpop.f32.mrf.mxu0  ;;  %3095 = vmatpush.bf16.msra.mxu1 %v5068_v46  ;;  %3265 = vmatpush.bf16.msrb.mxu3 %v5075_v39  ;;  %v5063_v39 = vld [vmem:[%s6270_s1 + $0x200] sm:$0xff] }
 0x142   : > { %v1701_v15 = vadd.f32 %v5945_v62, %v1690_v41  ;;  %v1289_v1 = vadd.f32 %v1279_v0, %v5919_v18  ;;  %v6083_v3 = vpop.f32.mrf.mxu2  ;;  %v5057_v18 = vld [vmem:[%s6270_s1 + $0x190] sm:$0xff]  ;;  %v5071_v41 = vld [vmem:[%s6270_s1 + $0x400] sm:$0xff] }
 0x143   : > { %v5136_v0 = vld [vmem:[#allocation2 + $0x10] sm:$0xff] }
 0x144   : > { %vm1709_vm12 = vcmp.gt.f32.partialorder %v1701_v15, 0.0  ;;  %v1717_v31 = vmul.f32 -0.419, %v1701_v15  ;;  %v1423_v25 = vadd.f32 %v6012_v61, %v1289_v1  ;;  %v5084_v61 = vld [vmem:[%s6270_s1 + $0x4a8] sm:$0xff]  ;;  %2848 = vmatmul.bf16.gmra.mxu3 %v5551_v5  ;;  %3174 = vmatpush.bf16.msrb.mxu2 %v5057_v18 }
 0x145   : > { %3364 = vmatpush.bf16.msra.mxu0 %v5084_v61  ;;  %3096 = vmatpush.bf16.msra.mxu1 %v5067_v6  ;;  %v6169_v18 = vld [vmem:[#allocation2 + $0x44] sm:$0xff] }
 0x146   : > { %v1725_v49 = vsel %vm1709_vm12, %v1701_v15, %v1717_v31  ;;  %v1557_v38 = vadd.f32 %v6024_v36, %v1423_v25  ;;  %3266 = vmatpush.bf16.msrb.mxu3 %v5074_v57  ;;  %v5080_v31 = vld [vmem:[%s6270_s1 + $0x488] sm:$0xff]  ;;  %v5079_v6 = vld [vmem:[%s6270_s1 + $0x480] sm:$0xff] }
 0x147   : > { %v1732_v47 = vadd.f32 %v1731_v55, %v1725_v49  ;;  %v2007_v19 = vpop.f32.mrf.mxu3 }
 0x148   : > { %v1691_v16 = vadd.f32 %v1681_v26, %v1557_v38  ;;  %3175 = vmatpush.bf16.msrb.mxu2 %v5056_v9  ;;  %v5081_v26 = vld [vmem:[%s6270_s1 + $0x490] sm:$0xff]  ;;  %v5140_v9 = vld [vmem:[#allocation2 + $0x58] sm:$0xff] }
 0x149   : > { %v1831_v24 = vpop.f32.mrf.mxu1  ;;  %v2104_v40 = vpop.f32.mrf.mxu0  ;;  %3365 = vmatpush.bf16.msra.mxu0 %v5083_v59 }
 0x14a   : > { %v1702_v13 = vadd.f32 %v5945_v62, %v1691_v16  ;;  %v1909_v36 = vadd.f32 %v6022_v22, %v1831_v24  ;;  %v1915_v5 = vpop.f32.mrf.mxu2  ;;  %v5066_v22 = vld [vmem:[%s6270_s1 + $0x218] sm:$0xff] }
 0x14b   : > { %3097 = vmatpush.bf16.msra.mxu1 %v5066_v22 }
 0x14c   : > { %vm1710_vm13 = vcmp.gt.f32.partialorder %v1702_v13, 0.0  ;;  %v1718_v50 = vmul.f32 -0.419, %v1702_v13  ;;  %v2022_v44 = vadd.f32 %v6038_v34, %v1909_v36  ;;  %2643 = vmatmul.bf16.vlgmr.msrb.gmra.mxu1 %v5134_v23  ;;  %2943 = vmatmul.bf16.vlgmr.msrb.gmra.mxu0 %v5653_v45  ;;  %v5073_v45 = vld [vmem:[%s6270_s1 + $0x410] sm:$0xff] }
 0x14d   : > { %3176 = vmatpush.bf16.msrb.mxu2 %v5055_v4  ;;  %3267 = vmatpush.bf16.msrb.mxu3 %v5073_v45 }
 0x14e   : > { %v1726_v53 = vsel %vm1710_vm13, %v1702_v13, %v1718_v50  ;;  %v6114_v28 = vadd.f32 %v2104_v40, %v2022_v44  ;;  %3366 = vmatpush.bf16.msra.mxu0 %v5082_v10  ;;  %v5139_v40 = vld [vmem:[#allocation2 + $0x18] sm:$0xff] }
 0x14f   : > { %v6125_v7 = vadd.f32 %v1732_v47, %v1726_v53  ;;  %2753 = vmatmul.bf16.gmra.mxu2 %v6127_v54  ;;  %v2009_v37 = vpop.f32.mrf.mxu3  ;;  %3098 = vmatpush.bf16.msra.mxu1 %v5065_v33 }
 0x151   : > { %v1833_v35 = vpop.f32.mrf.mxu1  ;;  %v2106_v11 = vpop.f32.mrf.mxu0  ;;  %5095 = vmatpush.bf16.msra.mxu2 %v6055_v52  ;;  %3268 = vmatpush.bf16.msrb.mxu3 %v5072_v2 }
 0x152   : > { %v1911_v34 = vadd.f32 %v6036_v14, %v1833_v35  ;;  %v1918_v30 = vpop.f32.mrf.mxu2  ;;  %3367 = vmatpush.bf16.msra.mxu0 %v5081_v26  ;;  %v5141_v35 = vld [vmem:[#allocation2 + $0x20] sm:$0xff] }
 0x154   : > { %v2023_v56 = vadd.f32 %v2004_v48, %v1911_v34  ;;  %2853 = vmatmul.bf16.gmra.mxu3 %v5589_v20  ;;  %v5142_v34 = vld [vmem:[#allocation2 + $0x60] sm:$0xff] }
 0x155   : > { %5096 = vmatpush.bf16.msra.mxu2 %v6067_v51  ;;  %3269 = vmatpush.bf16.msrb.mxu3 %v5071_v41  ;;  %v5064_v51 = vld [vmem:[%s6270_s1 + $0x208] sm:$0xff] }
 0x156   : > { %v6132_v42 = vadd.f32 %v2106_v11, %v2023_v56  ;;  %3099 = vmatpush.bf16.msra.mxu1 %v5064_v51  ;;  %3368 = vmatpush.bf16.msra.mxu0 %v5080_v31  ;;  %v5145_v51 = vld [vmem:[#allocation2 + $0x68] sm:$0xff] }
 0x157   : > { %v2012_v55 = vpop.f32.mrf.mxu3 }
 0x159   : > { %v1836_v14 = vpop.f32.mrf.mxu1  ;;  %v2109_v52 = vpop.f32.mrf.mxu0  ;;  %5097 = vmatpush.bf16.msra.mxu2 %v5084_v61 }
 0x15a   : > { %v1914_v32 = vadd.f32 %v6083_v3, %v1836_v14  ;;  %v1920_v43 = vpop.f32.mrf.mxu2  ;;  %3100 = vmatpush.bf16.msra.mxu1 %v5063_v39  ;;  %3369 = vmatpush.bf16.msra.mxu0 %v5079_v6 }
 0x15c   : > { %v2024_v17 = vadd.f32 %v2007_v19, %v1914_v32  ;;  %2648 = vmatmul.bf16.gmra.mxu1 %v5136_v0  ;;  %2948 = vmatmul.bf16.gmra.mxu0 %v5686_v63  ;;  %v5144_v0 = vld [vmem:[#allocation2 + $0x2c] sm:$0xff] }
 0x15d   : > { %5098 = vmatpush.bf16.msra.mxu2 %v5083_v59 }
 0x15e   : > { %v6150_v20 = vadd.f32 %v2109_v52, %v2024_v17  ;;  %v5143_v17 = vld [vmem:[#allocation2 + $0x30] sm:$0xff] }
 0x15f   : > { %2758 = vmatmul.bf16.gmra.mxu2 %v6158_v21  ;;  %v2014_v3 = vpop.f32.mrf.mxu3 }
 0x161   : > { %v1838_v46 = vpop.f32.mrf.mxu1  ;;  %v2111_v63 = vpop.f32.mrf.mxu0  ;;  %5099 = vmatpush.bf16.msra.mxu2 %v5082_v10 }
 0x162   : > { %v1916_v15 = vadd.f32 %v1915_v5, %v1838_v46  ;;  %v1923_v1 = vpop.f32.mrf.mxu2 }
 0x164   : > { %v2025_v48 = vadd.f32 %v2009_v37, %v1916_v15  ;;  %2858 = vmatmul.bf16.gmra.mxu3 %v6169_v18 }
 0x165   : > { %5100 = vmatpush.bf16.msra.mxu2 %v5081_v26 }
 0x166   : > { %v6164_v25 = vadd.f32 %v2111_v63, %v2025_v48 }
 0x167   : > { %v2017_v16 = vpop.f32.mrf.mxu3 }
 0x169   : > { %v1841_v49 = vpop.f32.mrf.mxu1  ;;  %v2114_v38 = vpop.f32.mrf.mxu0  ;;  %5101 = vmatpush.bf16.msra.mxu2 %v5080_v31 }
 0x16a   : > { %v1919_v61 = vadd.f32 %v1918_v30, %v1841_v49  ;;  %v1925_v47 = vpop.f32.mrf.mxu2 }
 0x16c   : > { %v2026_v24 = vadd.f32 %v2012_v55, %v1919_v61  ;;  %2653 = vmatmul.bf16.gmra.mxu1 %v5139_v40  ;;  %2953 = vmatmul.bf16.gmra.mxu0 %v5722_v12 }
 0x16d   : > { %5102 = vmatpush.bf16.msra.mxu2 %v5079_v6 }
 0x16e   : > { %v6176_v57 = vadd.f32 %v2114_v38, %v2026_v24 }
 0x16f   : > { %3177 = vmatmul.bf16.vlgmr.msrb.gmra.mxu2 %v5140_v9  ;;  %v2019_v50 = vpop.f32.mrf.mxu3 }
 0x171   : > { %v1843_v13 = vpop.f32.mrf.mxu1  ;;  %v2116_v36 = vpop.f32.mrf.mxu0 }
 0x172   : > { %v1921_v5 = vadd.f32 %v1920_v43, %v1843_v13  ;;  %v2308_v19 = vpop.f32.mrf.mxu2  ;;  %v5146_v13 = vld [vmem:[#allocation2 + $0x38] sm:$0xff] }
 0x174   : > { %v2027_v44 = vadd.f32 %v2014_v3, %v1921_v5  ;;  %3270 = vmatmul.bf16.vlgmr.msrb.gmra.mxu3 %v6017_v8  ;;  %v5148_v5 = vld [vmem:[#allocation2 + $0x70] sm:$0xff] }
 0x176   : > { %v6178_v23 = vadd.f32 %v2116_v36, %v2027_v44  ;;  %v5147_v36 = vld [vmem:[#allocation2 + $0x34] sm:$0xff] }
 0x177   : > { %v2475_v12 = vpop.f32.mrf.mxu3 }
 0x179   : > { %v1846_v4 = vpop.f32.mrf.mxu1  ;;  %v2119_v53 = vpop.f32.mrf.mxu0 }
 0x17a   : > { %v1924_v22 = vadd.f32 %v1923_v1, %v1846_v4  ;;  %v2310_v59 = vpop.f32.mrf.mxu2 }
 0x17c   : > { %v2028_v45 = vadd.f32 %v2017_v16, %v1924_v22  ;;  %2658 = vmatmul.bf16.gmra.mxu1 %v5141_v35  ;;  %2958 = vmatmul.bf16.gmra.mxu0 %v5741_v27 }
 0x17e   : > { %v6182_v11 = vadd.f32 %v2119_v53, %v2028_v45 }
 0x17f   : > { %3182 = vmatmul.bf16.gmra.mxu2 %v5142_v34  ;;  %v2477_v10 = vpop.f32.mrf.mxu3 }
 0x181   : > { %v1848_v30 = vpop.f32.mrf.mxu1  ;;  %v2121_v37 = vpop.f32.mrf.mxu0 }
 0x182   : > { %v1926_v56 = vadd.f32 %v1925_v47, %v1848_v30  ;;  %v2313_v33 = vpop.f32.mrf.mxu2 }
 0x184   : > { %v2029_v8 = vadd.f32 %v2019_v50, %v1926_v56  ;;  %3275 = vmatmul.bf16.gmra.mxu3 %v6069_v60 }
 0x186   : > { %v6184_v2 = vadd.f32 %v2121_v37, %v2029_v8 }
 0x187   : > { %v2480_v55 = vpop.f32.mrf.mxu3 }
 0x189   : > { %v2206_v14 = vpop.f32.mrf.mxu1  ;;  %v2551_v52 = vpop.f32.mrf.mxu0 }
 0x18a   : > { %v2226_v32 = vadd.f32 %v2206_v14, %v6114_v28  ;;  %v6188_v43 = vadd.f32 %v2551_v52, %v2475_v12  ;;  %v2315_v27 = vpop.f32.mrf.mxu2 }
 0x18c   : > { %v2328_v41 = vadd.f32 %v2308_v19, %v2226_v32  ;;  %3101 = vmatmul.bf16.vlgmr.msra.gmra.mxu1 %v5143_v17  ;;  %3370 = vmatmul.bf16.vlgmr.msra.gmra.mxu0 %v5144_v0  ;;  %v5149_v32 = vld [vmem:[#allocation2 + $0x3c] sm:$0xff] }
 0x18e   : > { %v2336_v63 = vadd.f32 %v5945_v62, %v2328_v41 }
 0x18f   : > { %3187 = vmatmul.bf16.gmra.mxu2 %v5145_v51  ;;  %v2482_v1 = vpop.f32.mrf.mxu3 }
 0x190   : > { %v2352_v48 = vmul.f32 -0.419, %v2336_v63  ;;  %vm2344_vm14 = vcmp.gt.f32.partialorder %v2336_v63, 0.0 }
 0x191   : > { %v2208_v26 = vpop.f32.mrf.mxu1  ;;  %v2553_v46 = vpop.f32.mrf.mxu0 }
 0x192   : > { %v2227_v60 = vadd.f32 %v2208_v26, %v6132_v42  ;;  %v6192_v15 = vadd.f32 %v2553_v46, %v2477_v10  ;;  %v2318_v28 = vpop.f32.mrf.mxu2  ;;  %v2360_v6 = vsel %vm2344_vm14, %v2336_v63, %v2352_v48 }
 0x194   : > { %v2329_v3 = vadd.f32 %v2310_v59, %v2227_v60  ;;  %3280 = vmatmul.bf16.gmra.mxu3 %v6127_v54 }
 0x196   : > { %v2337_v31 = vadd.f32 %v5945_v62, %v2329_v3 }
 0x197   : > { %v2485_v24 = vpop.f32.mrf.mxu3 }
 0x198   : > { %vm2345_vm15 = vcmp.gt.f32.partialorder %v2337_v31, 0.0  ;;  %v2353_v39 = vmul.f32 -0.419, %v2337_v31 }
 0x199   : > { %v2211_v49 = vpop.f32.mrf.mxu1  ;;  %v2556_v38 = vpop.f32.mrf.mxu0 }
 0x19a   : > { %v2361_v61 = vsel %vm2345_vm15, %v2337_v31, %v2353_v39  ;;  %v2228_v47 = vadd.f32 %v2211_v49, %v6150_v20  ;;  %v6197_v42 = vadd.f32 %v2556_v38, %v2480_v55  ;;  %v2320_v16 = vpop.f32.mrf.mxu2 }
 0x19b   : > { %v2368_v40 = vadd.f32 %v2361_v61, %v2360_v6 }
 0x19c   : > { %v2330_v9 = vadd.f32 %v2313_v33, %v2228_v47  ;;  %3106 = vmatmul.bf16.gmra.mxu1 %v5146_v13  ;;  %3375 = vmatmul.bf16.gmra.mxu0 %v5147_v36  ;;  %v1734_v13 = vrot.slane %v6125_v7, 4 }
 0x19e   : > { %v2338_v54 = vadd.f32 %v5945_v62, %v2330_v9 }
 0x19f   : > { %3192 = vmatmul.bf16.gmra.mxu2 %v5148_v5  ;;  %v2487_v59 = vpop.f32.mrf.mxu3  ;;  %v1735_v5 = vadd.f32 %v1734_v13, %v6125_v7 }
 0x1a0   : > { %vm2346_vm0 = vcmp.gt.f32.partialorder %v2338_v54, 0.0  ;;  %v2354_v19 = vmul.f32 -0.419, %v2338_v54 }
 0x1a1   : > { %v2213_v50 = vpop.f32.mrf.mxu1  ;;  %v2558_v44 = vpop.f32.mrf.mxu0 }
 0x1a2   : > { %v2362_v4 = vsel %vm2346_vm0, %v2338_v54, %v2354_v19  ;;  %v2229_v20 = vadd.f32 %v2213_v50, %v6164_v25  ;;  %v6201_v53 = vadd.f32 %v2558_v44, %v2482_v1  ;;  %v2323_v22 = vpop.f32.mrf.mxu2 }
 0x1a3   : > { %v2369_v12 = vadd.f32 %v2368_v40, %v2362_v4 }
 0x1a4   : > { %v2331_v45 = vadd.f32 %v2315_v27, %v2229_v20  ;;  %3285 = vmatmul.bf16.gmra.mxu3 %v6158_v21 }
 0x1a6   : > { %v2339_v35 = vadd.f32 %v5945_v62, %v2331_v45 }
 0x1a7   : > { %v2490_v8 = vpop.f32.mrf.mxu3 }
 0x1a8   : > { %vm2347_vm1 = vcmp.gt.f32.partialorder %v2339_v35, 0.0  ;;  %v2355_v34 = vmul.f32 -0.419, %v2339_v35 }
 0x1a9   : > { %v2216_v30 = vpop.f32.mrf.mxu1  ;;  %v2561_v37 = vpop.f32.mrf.mxu0 }
 0x1aa   : > { %v2363_v56 = vsel %vm2347_vm1, %v2339_v35, %v2355_v34  ;;  %v2230_v33 = vadd.f32 %v2216_v30, %v6176_v57  ;;  %v6206_v10 = vadd.f32 %v2561_v37, %v2485_v24  ;;  %v2325_v25 = vpop.f32.mrf.mxu2 }
 0x1ab   : > { %v2370_v14 = vadd.f32 %v2369_v12, %v2363_v56 }
 0x1ac   : > { %v2332_v52 = vadd.f32 %v2318_v28, %v2230_v33  ;;  %3111 = vmatmul.bf16.gmra.mxu1 %v5955_v58  ;;  %3380 = vmatmul.bf16.gmra.mxu0 %v5149_v32 }
 0x1ae   : > { %v2340_v27 = vadd.f32 %v5945_v62, %v2332_v52 }
 0x1af   : > { %3385 = vmatmul.bf16.vlgmr.msra.gmra.mxu2 %v6169_v18  ;;  %v2492_v26 = vpop.f32.mrf.mxu3 }
 0x1b0   : > { %vm2348_vm2 = vcmp.gt.f32.partialorder %v2340_v27, 0.0  ;;  %v2356_v21 = vmul.f32 -0.419, %v2340_v27 }
 0x1b1   : > { %v2218_v55 = vpop.f32.mrf.mxu1  ;;  %v2563_v41 = vpop.f32.mrf.mxu0 }
 0x1b2   : > { %v2364_v17 = vsel %vm2348_vm2, %v2340_v27, %v2356_v21  ;;  %v2231_v57 = vadd.f32 %v2218_v55, %v6178_v23  ;;  %v6212_v0 = vadd.f32 %v2563_v41, %v2487_v59  ;;  %v2744_v51 = vpop.f32.mrf.mxu2  ;;  %v1736_v59 = vrot.slane %v1735_v5, 2 }
 0x1b3   : > { %v2371_v46 = vadd.f32 %v2370_v14, %v2364_v17 }
 0x1b4   : > { %v2333_v63 = vadd.f32 %v2320_v16, %v2231_v57  ;;  %v1737_v30 = vadd.f32 %v1736_v59, %v1735_v5 }
 0x1b6   : > { %v2341_v58 = vadd.f32 %v5945_v62, %v2333_v63 }
 0x1b7   : > { %v2844_v39 = vpop.f32.mrf.mxu3 }
 0x1b8   : > { %vm2349_vm3 = vcmp.gt.f32.partialorder %v2341_v58, 0.0  ;;  %v2357_v60 = vmul.f32 -0.419, %v2341_v58 }
 0x1b9   : > { %v2221_v28 = vpop.f32.mrf.mxu1  ;;  %v2566_v1 = vpop.f32.mrf.mxu0 }
 0x1ba   : > { %v2365_v18 = vsel %vm2349_vm3, %v2341_v58, %v2357_v60  ;;  %v2232_v3 = vadd.f32 %v2221_v28, %v6182_v11  ;;  %v6216_v48 = vadd.f32 %v2566_v1, %v2490_v8  ;;  %v2746_v31 = vpop.f32.mrf.mxu2 }
 0x1bb   : > { %v2372_v23 = vadd.f32 %v2371_v46, %v2365_v18 }
 0x1bc   : > { %v2334_v49 = vadd.f32 %v2323_v22, %v2232_v3  ;;  %3116 = vmatmul.bf16.gmra.mxu1 %v5998_v29 }
 0x1be   : > { %v2342_v38 = vadd.f32 %v5945_v62, %v2334_v49 }
 0x1bf   : > { %v2846_v9 = vpop.f32.mrf.mxu3 }
 0x1c0   : > { %vm2350_vm4 = vcmp.gt.f32.partialorder %v2342_v38, 0.0  ;;  %v2358_v6 = vmul.f32 -0.419, %v2342_v38 }
 0x1c1   : > { %v2223_v61 = vpop.f32.mrf.mxu1  ;;  %v2568_v47 = vpop.f32.mrf.mxu0 }
 0x1c2   : > { %v2366_v16 = vsel %vm2350_vm4, %v2342_v38, %v2358_v6  ;;  %v2233_v24 = vadd.f32 %v2223_v61, %v6184_v2  ;;  %v2749_v40 = vpop.f32.mrf.mxu2 }
 0x1c3   : > { %v2373_v11 = vadd.f32 %v2372_v23, %v2366_v16 }
 0x1c4   : > { %v2335_v36 = vadd.f32 %v2325_v25, %v2233_v24 }
 0x1c6   : > { %v2343_v54 = vadd.f32 %v5945_v62, %v2335_v36 }
 0x1c7   : > { %v2849_v2 = vpop.f32.mrf.mxu3 }
 0x1c8   : > { %vm2351_vm5 = vcmp.gt.f32.partialorder %v2343_v54, 0.0  ;;  %v2359_v29 = vmul.f32 -0.419, %v2343_v54 }
 0x1c9   : > { %v2644_v19 = vpop.f32.mrf.mxu1  ;;  %v2944_v50 = vpop.f32.mrf.mxu0 }
 0x1ca   : > { %v2367_v44 = vsel %vm2351_vm5, %v2343_v54, %v2359_v29  ;;  %v2663_v4 = vadd.f32 %v2644_v19, %v6188_v43  ;;  %v2751_v20 = vpop.f32.mrf.mxu2  ;;  %v1738_v43 = vrot.slane %v1737_v30, 1 }
 0x1cb   : > { %v2374_v22 = vadd.f32 %v2373_v11, %v2367_v44 }
 0x1cc   : > { %v2763_v12 = vadd.f32 %v2744_v51, %v2663_v4  ;;  %v1739_v17 = vadd.f32 %v1738_v43, %v1737_v30 }
 0x1cd   : > { %v2376_v45 = vsel %vm2375_vm6, %v2374_v22, 0.0 }
 0x1ce   : > { %v2377_v35 = vrot.slane %v2376_v45, 4  ;;  %v2863_v34 = vadd.f32 %v2844_v39, %v2763_v12 }
 0x1cf   : > { %v2851_v52 = vpop.f32.mrf.mxu3 }
 0x1d0   : > { %v2378_v37 = vadd.f32 %v2377_v35, %v2376_v45  ;;  %v2963_v7 = vadd.f32 %v2944_v50, %v2863_v34 }
 0x1d1   : > { %v2646_v56 = vpop.f32.mrf.mxu1  ;;  %v2946_v33 = vpop.f32.mrf.mxu0 }
 0x1d2   : > { %v2379_v25 = vrot.slane %v2378_v37, 2  ;;  %v2664_v8 = vadd.f32 %v2646_v56, %v6192_v15  ;;  %v2754_v14 = vpop.f32.mrf.mxu2  ;;  %v2970_v55 = vadd.f32 %v5945_v62, %v2963_v7 }
 0x1d4   : > { %v2380_v32 = vadd.f32 %v2379_v25, %v2378_v37  ;;  %v2764_v27 = vadd.f32 %v2746_v31, %v2664_v8  ;;  %v2984_v63 = vmul.f32 -0.419, %v2970_v55  ;;  %vm2977_vm7 = vcmp.gt.f32.partialorder %v2970_v55, 0.0 }
 0x1d6   : > { %v2381_v21 = vrot.slane %v2380_v32, 1  ;;  %v2864_v41 = vadd.f32 %v2846_v9, %v2764_v27  ;;  %v2991_v31 = vsel %vm2977_vm7, %v2970_v55, %v2984_v63 }
 0x1d7   : > { %v2854_v28 = vpop.f32.mrf.mxu3 }
 0x1d8   : > { %v2382_v57 = vadd.f32 %v2381_v21, %v2380_v32  ;;  %v2964_v51 = vadd.f32 %v2946_v33, %v2864_v41 }
 0x1d9   : > { %v2649_v26 = vpop.f32.mrf.mxu1  ;;  %v2949_v46 = vpop.f32.mrf.mxu0 }
 0x1da   : > { %v2971_v58 = vadd.f32 %v5945_v62, %v2964_v51  ;;  %v2665_v60 = vadd.f32 %v2649_v26, %v6197_v42  ;;  %v2756_v15 = vpop.f32.mrf.mxu2  ;;  %v6230_v1 = vadd.f32 %v2382_v57, %v1739_v17 }
 0x1dc   : > { %vm2978_vm8 = vcmp.gt.f32.partialorder %v2971_v58, 0.0  ;;  %v2985_v18 = vmul.f32 -0.419, %v2971_v58  ;;  %v2765_v3 = vadd.f32 %v2749_v40, %v2665_v60 }
 0x1de   : > { %v2992_v39 = vsel %vm2978_vm8, %v2971_v58, %v2985_v18  ;;  %v2865_v23 = vadd.f32 %v2849_v2, %v2765_v3 }
 0x1df   : > { %v2998_v49 = vadd.f32 %v2992_v39, %v2991_v31  ;;  %v2856_v24 = vpop.f32.mrf.mxu3 }
 0x1e0   : > { %v2965_v38 = vadd.f32 %v2949_v46, %v2865_v23 }
 0x1e1   : > { %v2651_v6 = vpop.f32.mrf.mxu1  ;;  %v2951_v61 = vpop.f32.mrf.mxu0 }
 0x1e2   : > { %v2972_v47 = vadd.f32 %v5945_v62, %v2965_v38  ;;  %v2666_v16 = vadd.f32 %v2651_v6, %v6201_v53  ;;  %v2759_v42 = vpop.f32.mrf.mxu2 }
 0x1e4   : > { %vm2979_vm9 = vcmp.gt.f32.partialorder %v2972_v47, 0.0  ;;  %v2986_v9 = vmul.f32 -0.419, %v2972_v47  ;;  %v2766_v11 = vadd.f32 %v2751_v20, %v2666_v16 }
 0x1e6   : > { %v2993_v13 = vsel %vm2979_vm9, %v2972_v47, %v2986_v9  ;;  %v2866_v36 = vadd.f32 %v2851_v52, %v2766_v11 }
 0x1e7   : > { %v2999_v54 = vadd.f32 %v2998_v49, %v2993_v13  ;;  %v2859_v4 = vpop.f32.mrf.mxu3 }
 0x1e8   : > { %v2966_v40 = vadd.f32 %v2951_v61, %v2866_v36 }
 0x1e9   : > { %v2654_v5 = vpop.f32.mrf.mxu1  ;;  %v2954_v29 = vpop.f32.mrf.mxu0 }
 0x1ea   : > { %v2973_v19 = vadd.f32 %v5945_v62, %v2966_v40  ;;  %v2667_v50 = vadd.f32 %v2654_v5, %v6206_v10  ;;  %v2761_v44 = vpop.f32.mrf.mxu2  ;;  %v5175_v5 = vmov 0.0  }
 0x1eb   : > { %183 = vst [vmem:[%s6248_s16] sm:$0x1] %v5175_v5 }
 0x1ec   : > { %vm2980_vm10 = vcmp.gt.f32.partialorder %v2973_v19, 0.0  ;;  %v2987_v2 = vmul.f32 -0.419, %v2973_v19  ;;  %v2767_v53 = vadd.f32 %v2754_v14, %v2667_v50 }
 0x1ee   : > { %v2994_v22 = vsel %vm2980_vm10, %v2973_v19, %v2987_v2  ;;  %v2867_v59 = vadd.f32 %v2854_v28, %v2767_v53 }
 0x1ef   : > { %v3000_v12 = vadd.f32 %v2999_v54, %v2994_v22  ;;  %v2861_v7 = vpop.f32.mrf.mxu3 }
 0x1f0   : > { %v2967_v45 = vadd.f32 %v2954_v29, %v2867_v59 }
 0x1f1   : > { %v2656_v20 = vpop.f32.mrf.mxu1  ;;  %v2956_v35 = vpop.f32.mrf.mxu0 }
 0x1f2   : > { %v2974_v34 = vadd.f32 %v5945_v62, %v2967_v45  ;;  %v2668_v30 = vadd.f32 %v2656_v20, %v6212_v0  ;;  %v3178_v37 = vpop.f32.mrf.mxu2 }
 0x1f4   : > { %vm2981_vm11 = vcmp.gt.f32.partialorder %v2974_v34, 0.0  ;;  %v2988_v56 = vmul.f32 -0.419, %v2974_v34  ;;  %v2768_v10 = vadd.f32 %v2756_v15, %v2668_v30 }
 0x1f6   : > { %v2995_v33 = vsel %vm2981_vm11, %v2974_v34, %v2988_v56  ;;  %v2868_v25 = vadd.f32 %v2856_v24, %v2768_v10 }
 0x1f7   : > { %v3001_v8 = vadd.f32 %v3000_v12, %v2995_v33  ;;  %v3271_v55 = vpop.f32.mrf.mxu3 }
 0x1f8   : > { %v2968_v52 = vadd.f32 %v2956_v35, %v2868_v25 }
 0x1f9   : > { %v2659_v14 = vpop.f32.mrf.mxu1  ;;  %v2959_v43 = vpop.f32.mrf.mxu0 }
 0x1fa   : > { %v2975_v32 = vadd.f32 %v5945_v62, %v2968_v52  ;;  %v2669_v27 = vadd.f32 %v2659_v14, %v6216_v48  ;;  %v3180_v21 = vpop.f32.mrf.mxu2 }
 0x1fc   : > { %vm2982_vm12 = vcmp.gt.f32.partialorder %v2975_v32, 0.0  ;;  %v2989_v41 = vmul.f32 -0.419, %v2975_v32  ;;  %v2769_v0 = vadd.f32 %v2759_v42, %v2669_v27 }
 0x1fe   : > { %v2996_v17 = vsel %vm2982_vm12, %v2975_v32, %v2989_v41  ;;  %v2869_v57 = vadd.f32 %v2859_v4, %v2769_v0 }
 0x1ff   : > { %v3002_v51 = vadd.f32 %v3001_v8, %v2996_v17  ;;  %v3273_v15 = vpop.f32.mrf.mxu3  ;;  %v5150_v8 = vld [vmem:[%s6271_s2] ss:$0 sm:$0xff] }
 0x200   : > { %v2969_v26 = vadd.f32 %v2959_v43, %v2869_v57 }
 0x201   : > { %v2661_v46 = vpop.f32.mrf.mxu1  ;;  %v2961_v63 = vpop.f32.mrf.mxu0 }
 0x202   : > { %v2976_v58 = vadd.f32 %v5945_v62, %v2969_v26  ;;  %v3183_v60 = vpop.f32.mrf.mxu2 }
 0x204   : > { %vm2983_vm13 = vcmp.gt.f32.partialorder %v2976_v58, 0.0  ;;  %v2990_v28 = vmul.f32 -0.419, %v2976_v58 }
 0x206   : > { %v2997_v18 = vsel %vm2983_vm13, %v2976_v58, %v2990_v28 }
 0x207   : > { %v3003_v3 = vadd.f32 %v3002_v51, %v2997_v18  ;;  %v3276_v49 = vpop.f32.mrf.mxu3 }
 0x209   : > { %v3004_v48 = vrot.slane %v3003_v3, 4  ;;  %v3102_v31 = vpop.f32.mrf.mxu1  ;;  %v3371_v39 = vpop.f32.mrf.mxu0 }
 0x20a   : > { %v3185_v23 = vpop.f32.mrf.mxu2  ;;  %v3179_v2 = vadd.f32 %v3178_v37, %v3102_v31 }
 0x20b   : > { %v3005_v38 = vadd.f32 %v3004_v48, %v3003_v3 }
 0x20c   : > { %v3290_v12 = vadd.f32 %v3271_v55, %v3179_v2 }
 0x20d   : > { %v3006_v6 = vrot.slane %v3005_v38, 2 }
 0x20e   : > { %v3390_v10 = vadd.f32 %v3371_v39, %v3290_v12 }
 0x20f   : > { %v3007_v61 = vadd.f32 %v3006_v6, %v3005_v38  ;;  %v3278_v62 = vpop.f32.mrf.mxu3 }
 0x210   : > { %v3397_v43 = vadd.f32 %v5150_v8, %v3390_v10 }
 0x211   : > { %v3008_v47 = vrot.slane %v3007_v61, 1  ;;  %v3104_v16 = vpop.f32.mrf.mxu1  ;;  %v3373_v42 = vpop.f32.mrf.mxu0 }
 0x212   : > { %v3188_v24 = vpop.f32.mrf.mxu2  ;;  %v3181_v4 = vadd.f32 %v3180_v21, %v3104_v16  ;;  %v3411_v26 = vmul.f32 -0.419, %v3397_v43  ;;  %vm3404_vm15 = vcmp.gt.f32.partialorder %v3397_v43, 0.0 }
 0x213   : > { %v3009_v9 = vadd.f32 %v3008_v47, %v3007_v61 }
 0x214   : > { %v3291_v53 = vadd.f32 %v3273_v15, %v3181_v4  ;;  %v3418_v3 = vsel %vm3404_vm15, %v3397_v43, %v3411_v26 }
 0x215   : > { %v6242_v11 = vadd.f32 %v3009_v9, %v6230_v1 }
 0x216   : > { %v3391_v7 = vadd.f32 %v3373_v42, %v3291_v53 }
 0x217   : > { %v3281_v40 = vpop.f32.mrf.mxu3 }
 0x218   : > { %v3398_v37 = vadd.f32 %v5150_v8, %v3391_v7 }
 0x219   : > { %v3107_v13 = vpop.f32.mrf.mxu1  ;;  %v3376_v36 = vpop.f32.mrf.mxu0 }
 0x21a   : > { %v3190_v54 = vpop.f32.mrf.mxu2  ;;  %v3184_v1 = vadd.f32 %v3183_v60, %v3107_v13  ;;  %v3412_v0 = vmul.f32 -0.419, %v3398_v37  ;;  %vm3405_vm14 = vcmp.gt.f32.partialorder %v3398_v37, 0.0 }
 0x21c   : > { %v3292_v45 = vadd.f32 %v3276_v49, %v3184_v1  ;;  %v3419_v60 = vsel %vm3405_vm14, %v3398_v37, %v3412_v0 }
 0x21d   : > { %v3425_v49 = vadd.f32 %v3419_v60, %v3418_v3 }
 0x21e   : > { %v3392_v33 = vadd.f32 %v3376_v36, %v3292_v45 }
 0x21f   : > { %v3283_v44 = vpop.f32.mrf.mxu3 }
 0x220   : > { %v3399_v32 = vadd.f32 %v5150_v8, %v3392_v33 }
 0x221   : > { %v3109_v29 = vpop.f32.mrf.mxu1  ;;  %v3378_v19 = vpop.f32.mrf.mxu0 }
 0x222   : > { %v3193_v50 = vpop.f32.mrf.mxu2  ;;  %v3186_v22 = vadd.f32 %v3185_v23, %v3109_v29  ;;  %v3413_v46 = vmul.f32 -0.419, %v3399_v32  ;;  %vm3406_vm0 = vcmp.gt.f32.partialorder %v3399_v32, 0.0 }
 0x224   : > { %v3293_v56 = vadd.f32 %v3278_v62, %v3186_v22  ;;  %v3420_v48 = vsel %vm3406_vm0, %v3399_v32, %v3413_v46  ;;  %v3439_v22 = vld [vmem:[%s6248_s16] sm:$0x1] }
 0x225   : > { %v3426_v47 = vadd.f32 %v3425_v49, %v3420_v48 }
 0x226   : > { %v3393_v52 = vadd.f32 %v3378_v19, %v3293_v56 }
 0x227   : > { %v3286_v34 = vpop.f32.mrf.mxu3 }
 0x228   : > { %v3400_v17 = vadd.f32 %v5150_v8, %v3393_v52 }
 0x229   : > { %v3112_v59 = vpop.f32.mrf.mxu1  ;;  %v3381_v30 = vpop.f32.mrf.mxu0 }
 0x22a   : > { %v3189_v20 = vadd.f32 %v3188_v24, %v3112_v59  ;;  %v3195_v35 = vpop.f32.mrf.mxu2  ;;  %v3414_v15 = vmul.f32 -0.419, %v3400_v17  ;;  %vm3407_vm1 = vcmp.gt.f32.partialorder %v3400_v17, 0.0 }
 0x22c   : > { %v3294_v25 = vadd.f32 %v3281_v40, %v3189_v20  ;;  %v3421_v38 = vsel %vm3407_vm1, %v3400_v17, %v3414_v15 }
 0x22d   : > { %v3427_v24 = vadd.f32 %v3426_v47, %v3421_v38 }
 0x22e   : > { %v3394_v27 = vadd.f32 %v3381_v30, %v3294_v25 }
 0x22f   : > { %v3288_v41 = vpop.f32.mrf.mxu3 }
 0x230   : > { %v3401_v63 = vadd.f32 %v5150_v8, %v3394_v27 }
 0x231   : > { %v3114_v14 = vpop.f32.mrf.mxu1  ;;  %v3383_v51 = vpop.f32.mrf.mxu0 }
 0x232   : > { %v3191_v21 = vadd.f32 %v3190_v54, %v3114_v14  ;;  %v3386_v55 = vpop.f32.mrf.mxu2  ;;  %v3415_v31 = vmul.f32 -0.419, %v3401_v63  ;;  %vm3408_vm2 = vcmp.gt.f32.partialorder %v3401_v63, 0.0 }
 0x234   : > { %v3295_v57 = vadd.f32 %v3283_v44, %v3191_v21  ;;  %v3422_v16 = vsel %vm3408_vm2, %v3401_v63, %v3415_v31 }
 0x235   : > { %v3428_v13 = vadd.f32 %v3427_v24, %v3422_v16 }
 0x236   : > { %v3395_v58 = vadd.f32 %v3383_v51, %v3295_v57 }
 0x238   : > { %v3402_v28 = vadd.f32 %v5150_v8, %v3395_v58 }
 0x239   : > { %v3117_v18 = vpop.f32.mrf.mxu1 }
 0x23a   : > { %v3194_v39 = vadd.f32 %v3193_v50, %v3117_v18  ;;  %v3388_v23 = vpop.f32.mrf.mxu2  ;;  %v3416_v6 = vmul.f32 -0.419, %v3402_v28  ;;  %vm3409_vm3 = vcmp.gt.f32.partialorder %v3402_v28, 0.0 }
 0x23c   : > { %v3296_v61 = vadd.f32 %v3286_v34, %v3194_v39  ;;  %v3423_v62 = vsel %vm3409_vm3, %v3402_v28, %v3416_v6 }
 0x23d   : > { %v3429_v40 = vadd.f32 %v3428_v13, %v3423_v62 }
 0x23e   : > { %v3396_v42 = vadd.f32 %v3386_v55, %v3296_v61 }
 0x240   : > { %v3403_v9 = vadd.f32 %v5150_v8, %v3396_v42 }
 0x241   : > { %v3119_v36 = vpop.f32.mrf.mxu1 }
 0x242   : > { %vm3410_vm4 = vcmp.gt.f32.partialorder %v3403_v9, 0.0  ;;  %v3417_v54 = vmul.f32 -0.419, %v3403_v9 }
 0x244   : > { %v3424_v5 = vsel %vm3410_vm4, %v3403_v9, %v3417_v54 }
 0x245   : > { %v3430_v29 = vadd.f32 %v3429_v40, %v3424_v5 }
 0x247   : > { %v3431_v19 = vsel %vm2375_vm6, %v3430_v29, 0.0 }
 0x248   : > { %v3432_v50 = vrot.slane %v3431_v19, 4 }
 0x24a   : > { %v3433_v44 = vadd.f32 %v3432_v50, %v3431_v19 }
 0x24c   : > { %v3434_v4 = vrot.slane %v3433_v44, 2 }
 0x24e   : > { %v3435_v2 = vadd.f32 %v3434_v4, %v3433_v44 }
 0x250   : > { %v3436_v1 = vrot.slane %v3435_v2, 1 }
 0x252   : > { %v3437_v53 = vadd.f32 %v3436_v1, %v3435_v2 }
 0x254   : > { %v3438_v59 = vadd.f32 %v3437_v53, %v6242_v11 }
 0x256   : > { %v3440_v12 = vadd.f32 %v3439_v22, %v3438_v59 }
 0x258   : > { %3441 = vst [vmem:[%s6248_s16] sm:$0x1] %v3440_v12 }
 0x25f   : > { %v3445_v45 = vld [vmem:[%s6248_s16] sm:$0x1] }
 0x260   : > { %v3446_v20 = vmul.f32 0.0044444446, %v3445_v45 }
 0x262   : > { %3447 = vst [vmem:[%s6248_s16] sm:$0x1] %v3446_v20 }
 0x263 PF: > { %s13_s14 = sadd.s32 1, %s5173_s14   ;;  %s6277_s12 = smov %s5169_s13 }
 0x264   : > { %p10_p5 = scmp.ge.s32.totalorder %s13_s14, 4   ;;  %s6278_s13 = smov %s6280_s15 }
 0x266   :  { %12 = sbr.rel (!%p10_p5) target bundleno = 2 (0x2), region = 103 }

</bundles_post_ra>
